<compile_context>
chip_gen: v6e
topology: v6e:2x2x1
jax: 0.10.0
libtpu: 0.0.40
codegen_flags: <defaults>
</compile_context>

<pallas_src>
import functools
import math

import jax
import jax.numpy as jnp
from jax.experimental import pallas as pl
from jax.experimental.pallas import tpu as pltpu


def _resblock_kernel(x_ref, w_ref, b_ref, o_ref):
    """One (TM, TN) output tile.

    w_ref holds a packed [D_in, 2*TN] tile = [W_res tile | W_hid tile], so a
    single MXU dot produces both branches; split, ReLU the hidden half, add.
    """
    tn = o_ref.shape[-1]  # static block_n
    s = jnp.dot(x_ref[...], w_ref[...], preferred_element_type=jnp.float32)
    s = s + b_ref[...].astype(jnp.float32)            # f32 bias add
    rx = s[:, :tn]                                     # residual branch
    h = jnp.maximum(s[:, tn:], 0.0)                    # hidden branch + ReLU (f32)
    o_ref[...] = (h + rx).astype(o_ref.dtype)


def _pick_block(dim, candidates):
    """Largest candidate that exactly tiles `dim`; else fall back to full dim
    (a full-extent block always satisfies the (8,128) BlockSpec rule)."""
    for c in candidates:
        if c <= dim and dim % c == 0:
            return c
    return dim


def _pack_branches(w_res, w_hid, b_res, b_hid, block_n):
    """Interleave the two branches at block_n granularity along the output axis
    so N-tile j of the packed weight is [W_res[:, j*TN:(j+1)*TN] | W_hid[...]]."""
    d_in, d_out = w_res.shape
    nt = d_out // block_n

    def pack(a, b, lead):
        a = a.reshape(lead, nt, 1, block_n)
        b = b.reshape(lead, nt, 1, block_n)
        return jnp.concatenate([a, b], axis=2).reshape(lead, nt * 2 * block_n)

    w_cat = pack(w_res, w_hid, d_in)
    b_cat = pack(b_res.reshape(1, d_out), b_hid.reshape(1, d_out), 1)
    return w_cat, b_cat


@functools.partial(
    jax.jit,
    static_argnames=("block_m", "block_n", "use_bf16_matmul", "out_dtype"),
)
def resblock_forward(x, w_res, b_res, w_hid, b_hid, *, block_m=None, block_n=None,
                     use_bf16_matmul=True, out_dtype=None):
    """x: [B, D_in]; w_*: [D_in, D_out]; b_*: [1, D_out] -> [B, D_out]."""
    B, D_in = x.shape
    D_in_w, D_out = w_res.shape
    assert D_in_w == D_in
    out_dtype = out_dtype or x.dtype

    # Tile sizes: lane-dense N tiles (multiples of 128), sublane-aligned M tiles.
    # TODO(synk): ragged dims that none of the candidates divide fall back to a
    # single full-extent block instead of being padded/masked.
    if block_m is None:
        block_m = _pick_block(B, (256, 128, 64, 32, 16, 8))
    if block_n is None:
        block_n = _pick_block(D_out, (256, 128))

    w_cat, b_cat = _pack_branches(w_res, w_hid, b_res, b_hid, block_n)
    b_cat = b_cat.astype(jnp.float32)

    if use_bf16_matmul:
        # bf16 operands feed the MXU at full rate and halve weight DMA bytes;
        # accumulation / bias / ReLU / residual add stay in f32 in the kernel.
        x_mm = x.astype(jnp.bfloat16)
        w_mm = w_cat.astype(jnp.bfloat16)
    else:
        x_mm, w_mm = x, w_cat

    nb = B // block_m
    nn = D_out // block_n

    # VMEM budget (double-buffered x/out, weight+bias tiles), with headroom,
    # capped well under v7x's 64 MiB physical VMEM.
    in_bytes = jnp.dtype(x_mm.dtype).itemsize
    out_bytes = jnp.dtype(out_dtype).itemsize
    est = (2 * block_m * D_in * in_bytes          # x tiles (double-buffered)
           + 2 * D_in * 2 * block_n * in_bytes    # packed weight tiles
           + 2 * 2 * block_n * 4                  # packed bias tiles (f32)
           + 2 * block_m * block_n * out_bytes)   # output tiles
    vmem_limit = int(min(48 * 1024 * 1024, max(4 * 1024 * 1024, 3 * est)))

    return pl.pallas_call(
        _resblock_kernel,
        out_shape=jax.ShapeDtypeStruct((B, D_out), out_dtype),
        # Grid = (N tiles, batch tiles): batch is the inner axis, so the weight
        # block index (0, j) is constant across it and stays VMEM-resident.
        grid=(nn, nb),
        in_specs=[
            pl.BlockSpec((block_m, D_in), lambda j, i: (i, 0)),
            pl.BlockSpec((D_in, 2 * block_n), lambda j, i: (0, j)),
            pl.BlockSpec((1, 2 * block_n), lambda j, i: (0, j)),
        ],
        out_specs=pl.BlockSpec((block_m, block_n), lambda j, i: (i, j)),
        compiler_params=pltpu.CompilerParams(
            dimension_semantics=("parallel", "parallel"),  # megacore on v7x
            vmem_limit_bytes=vmem_limit,
        ),
    )(x_mm, w_mm, b_cat)


def init_resblock_params(key, input_size, out_size, dtype=jnp.float32):
    """Deterministic init matching nn.Linear's default U(-1/sqrt(in), 1/sqrt(in))."""
    bound = 1.0 / math.sqrt(input_size)
    k1, k2, k3, k4 = jax.random.split(key, 4)
    # Stored as [D_in, D_out] (transpose of PyTorch's [out, in]) for x @ W.
    w_res = jax.random.uniform(k1, (input_size, out_size), dtype, -bound, bound)
    b_res = jax.random.uniform(k2, (1, out_size), dtype, -bound, bound)
    w_hid = jax.random.uniform(k3, (input_size, out_size), dtype, -bound, bound)
    b_hid = jax.random.uniform(k4, (1, out_size), dtype, -bound, bound)
    return w_res, b_res, w_hid, b_hid


def resblock_reference(x, w_res, b_res, w_hid, b_hid):
    hp = jax.lax.Precision.HIGHEST
    rx = jnp.dot(x, w_res, precision=hp) + b_res
    h = jnp.maximum(jnp.dot(x, w_hid, precision=hp) + b_hid, 0.0)
    return h + rx


if __name__ == "__main__":
    key = jax.random.PRNGKey(0)
    kx1, kp1, kx2, kp2 = jax.random.split(key, 4)

    # --- Config A: realistic MLP sizes, exercises the 2-D tiled/pipelined path.
    batch, input_size, out_size, hidden_size = 512, 256, 512, 1024  # hidden_size unused by forward
    x = jax.random.normal(kx1, (batch, input_size), jnp.float32)
    params = init_resblock_params(kp1, input_size, out_size)
    ref = resblock_reference(x, *params)

    out_f32 = jax.block_until_ready(resblock_forward(x, *params, use_bf16_matmul=False))
    assert out_f32.shape == (batch, out_size)
    assert jnp.allclose(out_f32, ref, atol=1e-3, rtol=1e-3), "f32 mismatch vs reference"

    out_bf16 = jax.block_until_ready(resblock_forward(x, *params, use_bf16_matmul=True))
    assert out_bf16.shape == (batch, out_size)
    assert jnp.allclose(out_bf16, ref, atol=5e-2, rtol=5e-2), "bf16 mismatch vs reference"

    # --- Config B: tiny shapes (typical toy usage) take the full-block fallback path.
    b2, in2, out2 = 8, 32, 32
    x2 = jax.random.normal(kx2, (b2, in2), jnp.float32)
    params2 = init_resblock_params(kp2, in2, out2)
    out2_k = jax.block_until_ready(resblock_forward(x2, *params2, use_bf16_matmul=False))
    ref2 = resblock_reference(x2, *params2)
    assert out2_k.shape == (b2, out2)
    assert jnp.allclose(out2_k, ref2, atol=1e-4, rtol=1e-4), "small-shape mismatch vs reference"

    print("KERNEL_OK")
</pallas_src>

<mosaic_0001>
module attributes {stable_mosaic.version = 11 : i64} {
  func.func @_resblock_kernel(%arg0: i32, %arg1: i32, %arg2: memref<256x256xf32, #tpu.memory_space<vmem>>, %arg3: memref<256x512xf32, #tpu.memory_space<vmem>>, %arg4: memref<1x512xf32, #tpu.memory_space<vmem>>, %arg5: memref<256x256xf32, #tpu.memory_space<vmem>>) attributes {dimension_semantics = [#tpu.dimension_semantics<parallel>, #tpu.dimension_semantics<parallel>], iteration_bounds = array<i64: 2, 2>, scalar_prefetch = 0 : i64, scratch_operands = 0 : i64, tpu.core_type = #tpu.core_type<tc>, window_params = [{transform_indices = @transform_0, window_bounds = array<i64: 256, 256>}, {transform_indices = @transform_1, window_bounds = array<i64: 256, 512>}, {transform_indices = @transform_2, window_bounds = array<i64: 1, 512>}, {transform_indices = @transform_3, window_bounds = array<i64: 256, 256>}]} {
    %c0 = arith.constant 0 : index
    %c0_0 = arith.constant 0 : index
    %0 = vector.load %arg2[%c0, %c0_0] : memref<256x256xf32, #tpu.memory_space<vmem>>, vector<256x256xf32>
    %c0_1 = arith.constant 0 : index
    %c0_2 = arith.constant 0 : index
    %1 = vector.load %arg3[%c0_1, %c0_2] : memref<256x512xf32, #tpu.memory_space<vmem>>, vector<256x512xf32>
    %cst = arith.constant dense<0.000000e+00> : vector<256x512xf32>
    %2 = tpu.matmul %0, %1, %cst {dimension_numbers = #tpu.dot_dimension_numbers<[1], [0], [0], [1], [0, 0, 1, 1], [], []>} : vector<256x256xf32>, vector<256x512xf32>, vector<256x512xf32> -> vector<256x512xf32>
    %c0_3 = arith.constant 0 : index
    %c0_4 = arith.constant 0 : index
    %3 = vector.load %arg4[%c0_3, %c0_4] : memref<1x512xf32, #tpu.memory_space<vmem>>, vector<1x512xf32>
    %4 = vector.broadcast %3 : vector<1x512xf32> to vector<256x512xf32>
    %5 = arith.addf %2, %4 : vector<256x512xf32>
    %6 = vector.extract_strided_slice %5 {offsets = [0, 0], sizes = [256, 256], strides = [1, 1]} : vector<256x512xf32> to vector<256x256xf32>
    %7 = vector.extract_strided_slice %5 {offsets = [0, 256], sizes = [256, 256], strides = [1, 1]} : vector<256x512xf32> to vector<256x256xf32>
    %cst_5 = arith.constant 0.000000e+00 : f32
    %8 = vector.broadcast %cst_5 : f32 to vector<256x256xf32>
    %9 = arith.maximumf %7, %8 : vector<256x256xf32>
    %10 = arith.addf %9, %6 : vector<256x256xf32>
    %c0_6 = arith.constant 0 : index
    %c0_7 = arith.constant 0 : index
    %11 = vector.load %arg5[%c0_6, %c0_7] : memref<256x256xf32, #tpu.memory_space<vmem>>, vector<256x256xf32>
    tpu.vector_store %arg5[%c0_6, %c0_7], %10 {strides = array<i32>} : memref<256x256xf32, #tpu.memory_space<vmem>>, vector<256x256xf32>,
    return
  }
  func.func @transform_0(%arg0: i32, %arg1: i32) -> (i32, i32) {
    %c0_i32 = arith.constant 0 : i32
    %c0_i32_0 = arith.constant 0 : i32
    return %arg1, %c0_i32 : i32, i32
  }
  func.func @transform_1(%arg0: i32, %arg1: i32) -> (i32, i32) {
    %c0_i32 = arith.constant 0 : i32
    %c0_i32_0 = arith.constant 0 : i32
    return %c0_i32, %arg0 : i32, i32
  }
  func.func @transform_2(%arg0: i32, %arg1: i32) -> (i32, i32) {
    %c0_i32 = arith.constant 0 : i32
    %c0_i32_0 = arith.constant 0 : i32
    return %c0_i32, %arg0 : i32, i32
  }
  func.func @transform_3(%arg0: i32, %arg1: i32) -> (i32, i32) {
    %c0_i32 = arith.constant 0 : i32
    return %arg1, %arg0 : i32, i32
  }
}

</mosaic_0001>

<bundles_post_ra>
// kernel: resblock_forward.1
= control target key start
LH: loop header
LB: loop body
LE: loop exit
PB: predicated region body
PF: predicated region fallthrough
CT: control target
= control target key end

     0   :  { %8 = vsyncpa [#allocation4], 0  ;;  %s2644_s0 = inlined_call_operand.vmem [shape: f32[512,256], index: 0, kind: input, shape index: {}]   ;;  %s2645_s1 = inlined_call_operand.vmem [shape: f32[256,1024], index: 1, kind: input, shape index: {}]   ;;  %s2646_s2 = inlined_call_operand.vmem [shape: f32[1,1024], index: 2, kind: input, shape index: {}]   ;;  %s2647_s3 = inlined_call_operand.hbm [shape: f32[512,512], index: 3, kind: output, shape index: {}]  }
   0x1   :  { %10 = vsyncpa [#allocation4 + $0x1], 0  ;;  %s1792_s12 = smov 0   ;;  %s1794_s13 = smov 0  }
   0x2   :  { %s1796_s14 = smov 0   ;;  %s1798_s15 = smov 0  }
   0x3   :  { %s1800_s16 = smov 0   ;;  %s1802_s17 = smov 0  }
   0x4   :  { %s1804_s18 = smov 0   ;;  %s1806_s19 = smov 0  }
   0x5   :  { %s1808_s20 = smov 0   ;;  %s1810_s21 = smov 0  }
   0x6 LB: > { %s1544_s22 = sadd.s32 4294967295, %s1766_s21   ;;  %s1545_s23 = sadd.s32 4294967294, %s1766_s21   ;;  %s1766_s21 = sphi %s1810_s21, %s16_s21   ;;  %s1762_s20 = sphi %s1808_s20, %s2660_s20   ;;  %s1758_s19 = sphi %s1806_s19, %s2659_s19   ;;  %s1754_s18 = sphi %s1804_s18, %s2658_s18   ;;  %s1750_s17 = sphi %s1802_s17, %s2657_s17   ;;  %s1746_s16 = sphi %s1800_s16, %s2656_s16   ;;  %s1742_s15 = sphi %s1798_s15, %s2655_s15   ;;  %s1738_s14 = sphi %s1796_s14, %s2654_s14   ;;  %s1734_s13 = sphi %s1794_s13, %s2653_s13   ;;  %s1730_s12 = sphi %s1792_s12, %s2652_s12  }
   0x7   : > { %s25_s24 = sadd.s32 1, %s1758_s19  ;;  %s28_s25 = sadd.s32 1, %s1762_s20 }
   0x8   : > { %p26_p0 = scmp.ge.s32.totalorder %s25_s24, 2  ;;  %s61_s26 = sadd.s32 1, %s1746_s16 }
   0x9   : > { %p68_p1 = scmp.ne.s32.totalorder %s1746_s16, %s1742_s15  ;;  %p69_p2 = scmp.eq.s32.totalorder %s1766_s21, 0 }
   0xa   : > { %s2662_s24 = smov (%p26_p0, %s25_s24), 0  ;;  %s2664_s25 = smov (!%p26_p0, %s28_s25), %s1762_s20 }
   0xb   : > { %p1853_p3 = por %p69_p2, %p68_p1  ;;  %s110_s28 = ssub.s32 %s1758_s19, %s2662_s24 }
   0xc   : > { %p30_p4 = scmp.ge.s32.totalorder %s2664_s25, 2  ;;  %s115_s29 = sadd.s32 1, %s1738_s14 }
   0xd   : > { %p125_p5 = scmp.ne.s32.totalorder %s1738_s14, %s1734_s13  ;;  %p126_p6 = scmp.eq.s32.totalorder %s1544_s22, 3 }
   0xe   : > { %s2666_s25 = smov (%p30_p4, %s2664_s25), 0  ;;  %p131_p8 = scmp.ne.s32.totalorder %s1734_s13, %s1730_s12 }
   0xf   : > { %p1864_p7 = por %p126_p6, %p125_p5  ;;  %s58_s4 = ssub.s32 %s1762_s20, %s2666_s25 }
  0x10   : > { %p132_p9 = scmp.eq.s32.totalorder %s1545_s23, 3  ;;  %p59_p10 = scmp.eq.s32.totalorder %s58_s4, 0 }
  0x11   : > { %s112_s5 = sor.u32 %s110_s28, %s58_s4  ;;  %p1547_p13 = scmp.ge.s32.totalorder %s1766_s21, 4 }
  0x12   : > { %p113_p11 = scmp.eq.s32.totalorder %s112_s5, 0  ;;  %p1872_p12 = por %p132_p9, %p131_p8 }
  0x13   : > { %s1877_s7 = scalar_select %p59_p10, %s1746_s16, %s61_s26  }
  0x14   : > { %s1880_s8 = scalar_select %p113_p11, %s1738_s14, %s115_s29  }
  0x15   : > { %148 = sbr.rel (%p1547_p13) target bundleno = 94 (0x5e), region = 16 }
  0x1a   : > { %161 = sbr.rel (!%p1853_p3) target bundleno = 94 (0x5e), region = 24  ;;  %s163_s9 = sand.u32 (%p1853_p3), 1, %s1746_s16  }
  0x1b   : > { %s1565_s10 = sshll.u32 (%p1853_p3), %s1762_s20, 5  ;;  %s1548_s11 = sshll.u32 (%p1853_p3), %s163_s9, 10 }
  0x1c   : > { %s1890_s28 = scalar_lea.vmem (%p1853_p3), %s2645_s1, %s1565_s10  ;;  %s1895_s26 = scalar_lea.vmem (%p1853_p3), [#allocation2], %s1548_s11 }
  0x1d   : > { %v181_v0 = vld [vmem:[%s1890_s28] sm:$0xff] (%p1853_p3)  ;;  %v183_v1 = vld [vmem:[%s1890_s28 + $0x8] sm:$0xff] (%p1853_p3)  ;;  %v185_v2 = vld [vmem:[%s1890_s28 + $0x10] sm:$0xff] (%p1853_p3) }
  0x1e   : > { %182 = vst [vmem:[%s1895_s26] sm:$0xff] (%p1853_p3), %v181_v0  ;;  %184 = vst [vmem:[%s1895_s26 + $0x8] sm:$0xff] (%p1853_p3), %v183_v1  ;;  %v187_v3 = vld [vmem:[%s1890_s28 + $0x18] sm:$0xff] (%p1853_p3)  ;;  %v189_v4 = vld [vmem:[%s1890_s28 + $0x40] sm:$0xff] (%p1853_p3) }
  0x1f   : > { %186 = vst [vmem:[%s1895_s26 + $0x10] sm:$0xff] %v185_v2  ;;  %v191_v5 = vld [vmem:[%s1890_s28 + $0x48] sm:$0xff]  ;;  %188 = vst [vmem:[%s1895_s26 + $0x18] sm:$0xff] %v187_v3  ;;  %v193_v6 = vld [vmem:[%s1890_s28 + $0x50] sm:$0xff] }
  0x20   : > { %190 = vst [vmem:[%s1895_s26 + $0x20] sm:$0xff] %v189_v4  ;;  %192 = vst [vmem:[%s1895_s26 + $0x28] sm:$0xff] %v191_v5  ;;  %v195_v7 = vld [vmem:[%s1890_s28 + $0x58] sm:$0xff]  ;;  %v197_v8 = vld [vmem:[%s1890_s28 + $0x80] sm:$0xff] }
  0x21   : > { %194 = vst [vmem:[%s1895_s26 + $0x30] sm:$0xff] %v193_v6  ;;  %196 = vst [vmem:[%s1895_s26 + $0x38] sm:$0xff] %v195_v7  ;;  %v199_v9 = vld [vmem:[%s1890_s28 + $0x88] sm:$0xff]  ;;  %v201_v10 = vld [vmem:[%s1890_s28 + $0x90] sm:$0xff] }
  0x22   : > { %198 = vst [vmem:[%s1895_s26 + $0x40] sm:$0xff] %v197_v8  ;;  %v203_v11 = vld [vmem:[%s1890_s28 + $0x98] sm:$0xff]  ;;  %200 = vst [vmem:[%s1895_s26 + $0x48] sm:$0xff] %v199_v9  ;;  %v205_v12 = vld [vmem:[%s1890_s28 + $0xc0] sm:$0xff] }
  0x23   : > { %202 = vst [vmem:[%s1895_s26 + $0x50] sm:$0xff] %v201_v10  ;;  %204 = vst [vmem:[%s1895_s26 + $0x58] sm:$0xff] %v203_v11  ;;  %v207_v13 = vld [vmem:[%s1890_s28 + $0xc8] sm:$0xff]  ;;  %v209_v14 = vld [vmem:[%s1890_s28 + $0xd0] sm:$0xff] }
  0x24   : > { %206 = vst [vmem:[%s1895_s26 + $0x60] sm:$0xff] %v205_v12  ;;  %208 = vst [vmem:[%s1895_s26 + $0x68] sm:$0xff] %v207_v13  ;;  %v211_v15 = vld [vmem:[%s1890_s28 + $0xd8] sm:$0xff]  ;;  %v213_v16 = vld [vmem:[%s1890_s28 + $0x100] sm:$0xff] }
  0x25   : > { %210 = vst [vmem:[%s1895_s26 + $0x70] sm:$0xff] %v209_v14  ;;  %v215_v17 = vld [vmem:[%s1890_s28 + $0x108] sm:$0xff]  ;;  %212 = vst [vmem:[%s1895_s26 + $0x78] sm:$0xff] %v211_v15  ;;  %v217_v18 = vld [vmem:[%s1890_s28 + $0x110] sm:$0xff] }
  0x26   : > { %214 = vst [vmem:[%s1895_s26 + $0x80] sm:$0xff] %v213_v16  ;;  %216 = vst [vmem:[%s1895_s26 + $0x88] sm:$0xff] %v215_v17  ;;  %v219_v19 = vld [vmem:[%s1890_s28 + $0x118] sm:$0xff]  ;;  %v221_v20 = vld [vmem:[%s1890_s28 + $0x140] sm:$0xff] }
  0x27   : > { %218 = vst [vmem:[%s1895_s26 + $0x90] sm:$0xff] %v217_v18  ;;  %220 = vst [vmem:[%s1895_s26 + $0x98] sm:$0xff] %v219_v19  ;;  %v223_v21 = vld [vmem:[%s1890_s28 + $0x148] sm:$0xff]  ;;  %v225_v22 = vld [vmem:[%s1890_s28 + $0x150] sm:$0xff] }
  0x28   : > { %222 = vst [vmem:[%s1895_s26 + $0xa0] sm:$0xff] %v221_v20  ;;  %v227_v23 = vld [vmem:[%s1890_s28 + $0x158] sm:$0xff]  ;;  %224 = vst [vmem:[%s1895_s26 + $0xa8] sm:$0xff] %v223_v21  ;;  %v229_v24 = vld [vmem:[%s1890_s28 + $0x180] sm:$0xff] }
  0x29   : > { %226 = vst [vmem:[%s1895_s26 + $0xb0] sm:$0xff] %v225_v22  ;;  %228 = vst [vmem:[%s1895_s26 + $0xb8] sm:$0xff] %v227_v23  ;;  %v231_v25 = vld [vmem:[%s1890_s28 + $0x188] sm:$0xff]  ;;  %v233_v26 = vld [vmem:[%s1890_s28 + $0x190] sm:$0xff] }
  0x2a   : > { %230 = vst [vmem:[%s1895_s26 + $0xc0] sm:$0xff] %v229_v24  ;;  %232 = vst [vmem:[%s1895_s26 + $0xc8] sm:$0xff] %v231_v25  ;;  %v235_v27 = vld [vmem:[%s1890_s28 + $0x198] sm:$0xff]  ;;  %v237_v28 = vld [vmem:[%s1890_s28 + $0x1c0] sm:$0xff] }
  0x2b   : > { %234 = vst [vmem:[%s1895_s26 + $0xd0] sm:$0xff] %v233_v26  ;;  %v239_v29 = vld [vmem:[%s1890_s28 + $0x1c8] sm:$0xff]  ;;  %236 = vst [vmem:[%s1895_s26 + $0xd8] sm:$0xff] %v235_v27  ;;  %v241_v30 = vld [vmem:[%s1890_s28 + $0x1d0] sm:$0xff] }
  0x2c   : > { %238 = vst [vmem:[%s1895_s26 + $0xe0] sm:$0xff] %v237_v28  ;;  %240 = vst [vmem:[%s1895_s26 + $0xe8] sm:$0xff] %v239_v29  ;;  %v243_v31 = vld [vmem:[%s1890_s28 + $0x1d8] sm:$0xff]  ;;  %v245_v32 = vld [vmem:[%s1890_s28 + $0x200] sm:$0xff] }
  0x2d   : > { %242 = vst [vmem:[%s1895_s26 + $0xf0] sm:$0xff] %v241_v30  ;;  %244 = vst [vmem:[%s1895_s26 + $0xf8] sm:$0xff] %v243_v31  ;;  %v247_v33 = vld [vmem:[%s1890_s28 + $0x208] sm:$0xff]  ;;  %v249_v34 = vld [vmem:[%s1890_s28 + $0x210] sm:$0xff] }
  0x2e   : > { %246 = vst [vmem:[%s1895_s26 + $0x100] sm:$0xff] %v245_v32  ;;  %v251_v35 = vld [vmem:[%s1890_s28 + $0x218] sm:$0xff]  ;;  %248 = vst [vmem:[%s1895_s26 + $0x108] sm:$0xff] %v247_v33  ;;  %v253_v36 = vld [vmem:[%s1890_s28 + $0x240] sm:$0xff] }
  0x2f   : > { %250 = vst [vmem:[%s1895_s26 + $0x110] sm:$0xff] %v249_v34  ;;  %252 = vst [vmem:[%s1895_s26 + $0x118] sm:$0xff] %v251_v35  ;;  %v255_v37 = vld [vmem:[%s1890_s28 + $0x248] sm:$0xff]  ;;  %v257_v38 = vld [vmem:[%s1890_s28 + $0x250] sm:$0xff] }
  0x30   : > { %254 = vst [vmem:[%s1895_s26 + $0x120] sm:$0xff] %v253_v36  ;;  %256 = vst [vmem:[%s1895_s26 + $0x128] sm:$0xff] %v255_v37  ;;  %v259_v39 = vld [vmem:[%s1890_s28 + $0x258] sm:$0xff]  ;;  %v261_v40 = vld [vmem:[%s1890_s28 + $0x280] sm:$0xff] }
  0x31   : > { %258 = vst [vmem:[%s1895_s26 + $0x130] sm:$0xff] %v257_v38  ;;  %v263_v41 = vld [vmem:[%s1890_s28 + $0x288] sm:$0xff]  ;;  %260 = vst [vmem:[%s1895_s26 + $0x138] sm:$0xff] %v259_v39  ;;  %v265_v42 = vld [vmem:[%s1890_s28 + $0x290] sm:$0xff] }
  0x32   : > { %262 = vst [vmem:[%s1895_s26 + $0x140] sm:$0xff] %v261_v40  ;;  %264 = vst [vmem:[%s1895_s26 + $0x148] sm:$0xff] %v263_v41  ;;  %v267_v43 = vld [vmem:[%s1890_s28 + $0x298] sm:$0xff]  ;;  %v269_v44 = vld [vmem:[%s1890_s28 + $0x2c0] sm:$0xff] }
  0x33   : > { %266 = vst [vmem:[%s1895_s26 + $0x150] sm:$0xff] %v265_v42  ;;  %268 = vst [vmem:[%s1895_s26 + $0x158] sm:$0xff] %v267_v43  ;;  %v271_v45 = vld [vmem:[%s1890_s28 + $0x2c8] sm:$0xff]  ;;  %v273_v46 = vld [vmem:[%s1890_s28 + $0x2d0] sm:$0xff] }
  0x34   : > { %270 = vst [vmem:[%s1895_s26 + $0x160] sm:$0xff] %v269_v44  ;;  %v275_v47 = vld [vmem:[%s1890_s28 + $0x2d8] sm:$0xff]  ;;  %272 = vst [vmem:[%s1895_s26 + $0x168] sm:$0xff] %v271_v45  ;;  %v277_v48 = vld [vmem:[%s1890_s28 + $0x300] sm:$0xff] }
  0x35   : > { %274 = vst [vmem:[%s1895_s26 + $0x170] sm:$0xff] %v273_v46  ;;  %276 = vst [vmem:[%s1895_s26 + $0x178] sm:$0xff] %v275_v47  ;;  %v279_v49 = vld [vmem:[%s1890_s28 + $0x308] sm:$0xff]  ;;  %v281_v50 = vld [vmem:[%s1890_s28 + $0x310] sm:$0xff] }
  0x36   : > { %278 = vst [vmem:[%s1895_s26 + $0x180] sm:$0xff] %v277_v48  ;;  %280 = vst [vmem:[%s1895_s26 + $0x188] sm:$0xff] %v279_v49  ;;  %v283_v51 = vld [vmem:[%s1890_s28 + $0x318] sm:$0xff]  ;;  %v285_v52 = vld [vmem:[%s1890_s28 + $0x340] sm:$0xff] }
  0x37   : > { %282 = vst [vmem:[%s1895_s26 + $0x190] sm:$0xff] %v281_v50  ;;  %v287_v53 = vld [vmem:[%s1890_s28 + $0x348] sm:$0xff]  ;;  %284 = vst [vmem:[%s1895_s26 + $0x198] sm:$0xff] %v283_v51  ;;  %v289_v54 = vld [vmem:[%s1890_s28 + $0x350] sm:$0xff] }
  0x38   : > { %286 = vst [vmem:[%s1895_s26 + $0x1a0] sm:$0xff] %v285_v52  ;;  %288 = vst [vmem:[%s1895_s26 + $0x1a8] sm:$0xff] %v287_v53  ;;  %v291_v55 = vld [vmem:[%s1890_s28 + $0x358] sm:$0xff]  ;;  %v293_v56 = vld [vmem:[%s1890_s28 + $0x380] sm:$0xff] }
  0x39   : > { %290 = vst [vmem:[%s1895_s26 + $0x1b0] sm:$0xff] %v289_v54  ;;  %292 = vst [vmem:[%s1895_s26 + $0x1b8] sm:$0xff] %v291_v55  ;;  %v295_v57 = vld [vmem:[%s1890_s28 + $0x388] sm:$0xff]  ;;  %v297_v58 = vld [vmem:[%s1890_s28 + $0x390] sm:$0xff] }
  0x3a   : > { %294 = vst [vmem:[%s1895_s26 + $0x1c0] sm:$0xff] %v293_v56  ;;  %v299_v59 = vld [vmem:[%s1890_s28 + $0x398] sm:$0xff]  ;;  %296 = vst [vmem:[%s1895_s26 + $0x1c8] sm:$0xff] %v295_v57  ;;  %v301_v60 = vld [vmem:[%s1890_s28 + $0x3c0] sm:$0xff] }
  0x3b   : > { %298 = vst [vmem:[%s1895_s26 + $0x1d0] sm:$0xff] %v297_v58  ;;  %300 = vst [vmem:[%s1895_s26 + $0x1d8] sm:$0xff] %v299_v59  ;;  %v303_v61 = vld [vmem:[%s1890_s28 + $0x3c8] sm:$0xff]  ;;  %v305_v62 = vld [vmem:[%s1890_s28 + $0x3d0] sm:$0xff] }
  0x3c   : > { %302 = vst [vmem:[%s1895_s26 + $0x1e0] sm:$0xff] %v301_v60  ;;  %304 = vst [vmem:[%s1895_s26 + $0x1e8] sm:$0xff] %v303_v61  ;;  %v307_v63 = vld [vmem:[%s1890_s28 + $0x3d8] sm:$0xff]  ;;  %v309_v0 = vld [vmem:[%s1890_s28 + $0x400] sm:$0xff] }
  0x3d   : > { %306 = vst [vmem:[%s1895_s26 + $0x1f0] sm:$0xff] %v305_v62  ;;  %v311_v1 = vld [vmem:[%s1890_s28 + $0x408] sm:$0xff]  ;;  %308 = vst [vmem:[%s1895_s26 + $0x1f8] sm:$0xff] %v307_v63  ;;  %v313_v2 = vld [vmem:[%s1890_s28 + $0x410] sm:$0xff] }
  0x3e   : > { %310 = vst [vmem:[%s1895_s26 + $0x200] sm:$0xff] %v309_v0  ;;  %312 = vst [vmem:[%s1895_s26 + $0x208] sm:$0xff] %v311_v1  ;;  %v315_v3 = vld [vmem:[%s1890_s28 + $0x418] sm:$0xff]  ;;  %v317_v4 = vld [vmem:[%s1890_s28 + $0x440] sm:$0xff] }
  0x3f   : > { %314 = vst [vmem:[%s1895_s26 + $0x210] sm:$0xff] %v313_v2  ;;  %316 = vst [vmem:[%s1895_s26 + $0x218] sm:$0xff] %v315_v3  ;;  %v319_v5 = vld [vmem:[%s1890_s28 + $0x448] sm:$0xff]  ;;  %v321_v6 = vld [vmem:[%s1890_s28 + $0x450] sm:$0xff] }
  0x40   : > { %318 = vst [vmem:[%s1895_s26 + $0x220] sm:$0xff] %v317_v4  ;;  %v323_v7 = vld [vmem:[%s1890_s28 + $0x458] sm:$0xff]  ;;  %320 = vst [vmem:[%s1895_s26 + $0x228] sm:$0xff] %v319_v5  ;;  %v325_v8 = vld [vmem:[%s1890_s28 + $0x480] sm:$0xff] }
  0x41   : > { %322 = vst [vmem:[%s1895_s26 + $0x230] sm:$0xff] %v321_v6  ;;  %324 = vst [vmem:[%s1895_s26 + $0x238] sm:$0xff] %v323_v7  ;;  %v327_v9 = vld [vmem:[%s1890_s28 + $0x488] sm:$0xff]  ;;  %v329_v10 = vld [vmem:[%s1890_s28 + $0x490] sm:$0xff] }
  0x42   : > { %326 = vst [vmem:[%s1895_s26 + $0x240] sm:$0xff] %v325_v8  ;;  %328 = vst [vmem:[%s1895_s26 + $0x248] sm:$0xff] %v327_v9  ;;  %v331_v11 = vld [vmem:[%s1890_s28 + $0x498] sm:$0xff]  ;;  %v333_v12 = vld [vmem:[%s1890_s28 + $0x4c0] sm:$0xff] }
  0x43   : > { %330 = vst [vmem:[%s1895_s26 + $0x250] sm:$0xff] %v329_v10  ;;  %v335_v13 = vld [vmem:[%s1890_s28 + $0x4c8] sm:$0xff]  ;;  %332 = vst [vmem:[%s1895_s26 + $0x258] sm:$0xff] %v331_v11  ;;  %v337_v14 = vld [vmem:[%s1890_s28 + $0x4d0] sm:$0xff] }
  0x44   : > { %334 = vst [vmem:[%s1895_s26 + $0x260] sm:$0xff] %v333_v12  ;;  %336 = vst [vmem:[%s1895_s26 + $0x268] sm:$0xff] %v335_v13  ;;  %v339_v15 = vld [vmem:[%s1890_s28 + $0x4d8] sm:$0xff]  ;;  %v341_v16 = vld [vmem:[%s1890_s28 + $0x500] sm:$0xff] }
  0x45   : > { %338 = vst [vmem:[%s1895_s26 + $0x270] sm:$0xff] %v337_v14  ;;  %340 = vst [vmem:[%s1895_s26 + $0x278] sm:$0xff] %v339_v15  ;;  %v343_v17 = vld [vmem:[%s1890_s28 + $0x508] sm:$0xff]  ;;  %v345_v18 = vld [vmem:[%s1890_s28 + $0x510] sm:$0xff] }
  0x46   : > { %342 = vst [vmem:[%s1895_s26 + $0x280] sm:$0xff] %v341_v16  ;;  %v347_v19 = vld [vmem:[%s1890_s28 + $0x518] sm:$0xff]  ;;  %344 = vst [vmem:[%s1895_s26 + $0x288] sm:$0xff] %v343_v17  ;;  %v349_v20 = vld [vmem:[%s1890_s28 + $0x540] sm:$0xff] }
  0x47   : > { %346 = vst [vmem:[%s1895_s26 + $0x290] sm:$0xff] %v345_v18  ;;  %348 = vst [vmem:[%s1895_s26 + $0x298] sm:$0xff] %v347_v19  ;;  %v351_v21 = vld [vmem:[%s1890_s28 + $0x548] sm:$0xff]  ;;  %v353_v22 = vld [vmem:[%s1890_s28 + $0x550] sm:$0xff] }
  0x48   : > { %350 = vst [vmem:[%s1895_s26 + $0x2a0] sm:$0xff] %v349_v20  ;;  %352 = vst [vmem:[%s1895_s26 + $0x2a8] sm:$0xff] %v351_v21  ;;  %v355_v23 = vld [vmem:[%s1890_s28 + $0x558] sm:$0xff]  ;;  %v357_v24 = vld [vmem:[%s1890_s28 + $0x580] sm:$0xff] }
  0x49   : > { %354 = vst [vmem:[%s1895_s26 + $0x2b0] sm:$0xff] %v353_v22  ;;  %v359_v25 = vld [vmem:[%s1890_s28 + $0x588] sm:$0xff]  ;;  %356 = vst [vmem:[%s1895_s26 + $0x2b8] sm:$0xff] %v355_v23  ;;  %v361_v26 = vld [vmem:[%s1890_s28 + $0x590] sm:$0xff] }
  0x4a   : > { %358 = vst [vmem:[%s1895_s26 + $0x2c0] sm:$0xff] %v357_v24  ;;  %360 = vst [vmem:[%s1895_s26 + $0x2c8] sm:$0xff] %v359_v25  ;;  %v363_v27 = vld [vmem:[%s1890_s28 + $0x598] sm:$0xff]  ;;  %v365_v28 = vld [vmem:[%s1890_s28 + $0x5c0] sm:$0xff] }
  0x4b   : > { %362 = vst [vmem:[%s1895_s26 + $0x2d0] sm:$0xff] %v361_v26  ;;  %364 = vst [vmem:[%s1895_s26 + $0x2d8] sm:$0xff] %v363_v27  ;;  %v367_v29 = vld [vmem:[%s1890_s28 + $0x5c8] sm:$0xff]  ;;  %v369_v30 = vld [vmem:[%s1890_s28 + $0x5d0] sm:$0xff] }
  0x4c   : > { %366 = vst [vmem:[%s1895_s26 + $0x2e0] sm:$0xff] %v365_v28  ;;  %v371_v31 = vld [vmem:[%s1890_s28 + $0x5d8] sm:$0xff]  ;;  %368 = vst [vmem:[%s1895_s26 + $0x2e8] sm:$0xff] %v367_v29  ;;  %v373_v32 = vld [vmem:[%s1890_s28 + $0x600] sm:$0xff] }
  0x4d   : > { %370 = vst [vmem:[%s1895_s26 + $0x2f0] sm:$0xff] %v369_v30  ;;  %372 = vst [vmem:[%s1895_s26 + $0x2f8] sm:$0xff] %v371_v31  ;;  %v375_v33 = vld [vmem:[%s1890_s28 + $0x608] sm:$0xff]  ;;  %v377_v34 = vld [vmem:[%s1890_s28 + $0x610] sm:$0xff] }
  0x4e   : > { %374 = vst [vmem:[%s1895_s26 + $0x300] sm:$0xff] %v373_v32  ;;  %376 = vst [vmem:[%s1895_s26 + $0x308] sm:$0xff] %v375_v33  ;;  %v379_v35 = vld [vmem:[%s1890_s28 + $0x618] sm:$0xff]  ;;  %v381_v36 = vld [vmem:[%s1890_s28 + $0x640] sm:$0xff] }
  0x4f   : > { %378 = vst [vmem:[%s1895_s26 + $0x310] sm:$0xff] %v377_v34  ;;  %v383_v37 = vld [vmem:[%s1890_s28 + $0x648] sm:$0xff]  ;;  %380 = vst [vmem:[%s1895_s26 + $0x318] sm:$0xff] %v379_v35  ;;  %v385_v38 = vld [vmem:[%s1890_s28 + $0x650] sm:$0xff] }
  0x50   : > { %382 = vst [vmem:[%s1895_s26 + $0x320] sm:$0xff] %v381_v36  ;;  %384 = vst [vmem:[%s1895_s26 + $0x328] sm:$0xff] %v383_v37  ;;  %v387_v39 = vld [vmem:[%s1890_s28 + $0x658] sm:$0xff]  ;;  %v389_v40 = vld [vmem:[%s1890_s28 + $0x680] sm:$0xff] }
  0x51   : > { %386 = vst [vmem:[%s1895_s26 + $0x330] sm:$0xff] %v385_v38  ;;  %388 = vst [vmem:[%s1895_s26 + $0x338] sm:$0xff] %v387_v39  ;;  %v391_v41 = vld [vmem:[%s1890_s28 + $0x688] sm:$0xff]  ;;  %v393_v42 = vld [vmem:[%s1890_s28 + $0x690] sm:$0xff] }
  0x52   : > { %390 = vst [vmem:[%s1895_s26 + $0x340] sm:$0xff] %v389_v40  ;;  %v395_v43 = vld [vmem:[%s1890_s28 + $0x698] sm:$0xff]  ;;  %392 = vst [vmem:[%s1895_s26 + $0x348] sm:$0xff] %v391_v41  ;;  %v397_v44 = vld [vmem:[%s1890_s28 + $0x6c0] sm:$0xff] }
  0x53   : > { %394 = vst [vmem:[%s1895_s26 + $0x350] sm:$0xff] %v393_v42  ;;  %396 = vst [vmem:[%s1895_s26 + $0x358] sm:$0xff] %v395_v43  ;;  %v399_v45 = vld [vmem:[%s1890_s28 + $0x6c8] sm:$0xff]  ;;  %v401_v46 = vld [vmem:[%s1890_s28 + $0x6d0] sm:$0xff] }
  0x54   : > { %398 = vst [vmem:[%s1895_s26 + $0x360] sm:$0xff] %v397_v44  ;;  %400 = vst [vmem:[%s1895_s26 + $0x368] sm:$0xff] %v399_v45  ;;  %v403_v47 = vld [vmem:[%s1890_s28 + $0x6d8] sm:$0xff]  ;;  %v405_v48 = vld [vmem:[%s1890_s28 + $0x700] sm:$0xff] }
  0x55   : > { %402 = vst [vmem:[%s1895_s26 + $0x370] sm:$0xff] %v401_v46  ;;  %v407_v49 = vld [vmem:[%s1890_s28 + $0x708] sm:$0xff]  ;;  %404 = vst [vmem:[%s1895_s26 + $0x378] sm:$0xff] %v403_v47  ;;  %v409_v50 = vld [vmem:[%s1890_s28 + $0x710] sm:$0xff] }
  0x56   : > { %406 = vst [vmem:[%s1895_s26 + $0x380] sm:$0xff] %v405_v48  ;;  %408 = vst [vmem:[%s1895_s26 + $0x388] sm:$0xff] %v407_v49  ;;  %v411_v51 = vld [vmem:[%s1890_s28 + $0x718] sm:$0xff]  ;;  %v413_v52 = vld [vmem:[%s1890_s28 + $0x740] sm:$0xff] }
  0x57   : > { %410 = vst [vmem:[%s1895_s26 + $0x390] sm:$0xff] %v409_v50  ;;  %412 = vst [vmem:[%s1895_s26 + $0x398] sm:$0xff] %v411_v51  ;;  %v415_v53 = vld [vmem:[%s1890_s28 + $0x748] sm:$0xff]  ;;  %v417_v54 = vld [vmem:[%s1890_s28 + $0x750] sm:$0xff] }
  0x58   : > { %414 = vst [vmem:[%s1895_s26 + $0x3a0] sm:$0xff] %v413_v52  ;;  %v419_v55 = vld [vmem:[%s1890_s28 + $0x758] sm:$0xff]  ;;  %416 = vst [vmem:[%s1895_s26 + $0x3a8] sm:$0xff] %v415_v53  ;;  %v421_v56 = vld [vmem:[%s1890_s28 + $0x780] sm:$0xff] }
  0x59   : > { %418 = vst [vmem:[%s1895_s26 + $0x3b0] sm:$0xff] %v417_v54  ;;  %420 = vst [vmem:[%s1895_s26 + $0x3b8] sm:$0xff] %v419_v55  ;;  %v423_v57 = vld [vmem:[%s1890_s28 + $0x788] sm:$0xff]  ;;  %v425_v58 = vld [vmem:[%s1890_s28 + $0x790] sm:$0xff] }
  0x5a   : > { %422 = vst [vmem:[%s1895_s26 + $0x3c0] sm:$0xff] %v421_v56  ;;  %424 = vst [vmem:[%s1895_s26 + $0x3c8] sm:$0xff] %v423_v57  ;;  %v427_v59 = vld [vmem:[%s1890_s28 + $0x798] sm:$0xff]  ;;  %v429_v60 = vld [vmem:[%s1890_s28 + $0x7c0] sm:$0xff] }
  0x5b   : > { %426 = vst [vmem:[%s1895_s26 + $0x3d0] sm:$0xff] %v425_v58  ;;  %v431_v61 = vld [vmem:[%s1890_s28 + $0x7c8] sm:$0xff]  ;;  %428 = vst [vmem:[%s1895_s26 + $0x3d8] sm:$0xff] %v427_v59  ;;  %v433_v62 = vld [vmem:[%s1890_s28 + $0x7d0] sm:$0xff] }
  0x5c   : > { %430 = vst [vmem:[%s1895_s26 + $0x3e0] sm:$0xff] %v429_v60  ;;  %432 = vst [vmem:[%s1895_s26 + $0x3e8] sm:$0xff] %v431_v61  ;;  %v435_v63 = vld [vmem:[%s1890_s28 + $0x7d8] sm:$0xff] }
  0x5d   : > { %434 = vst [vmem:[%s1895_s26 + $0x3f0] sm:$0xff] %v433_v62  ;;  %436 = vst [vmem:[%s1895_s26 + $0x3f8] sm:$0xff] %v435_v63 }
  0x5e PF: > { %p1551_p0 = scmp.ge.s32.totalorder %s1766_s21, 1  ;;  %p449_p1 = scmp.lt.s32.totalorder %s1766_s21, 5 }
  0x60   : > { %p450_p2 = pnand %p1551_p0, %p449_p1 }
  0x61   : > { %s456_s27 = sand.u32 (!%p450_p2), 1, %s1742_s15   ;;  %s1554_s15 = sshll.u32 (!%p450_p2), %s1750_s17, 5 }
  0x62   : > { %453 = sbr.rel (%p450_p2) target bundleno = 509 (0x1fd), region = 51  ;;  %s1552_s29 = sshll.u32 (!%p450_p2), %s456_s27, 10 }
  0x63   : > { %s2153_s4 = scalar_lea.vmem (!%p450_p2), [#allocation2], %s1552_s29  ;;  %p2258_p3 = scmp.lt.s32.totalorder (!%p450_p2), %s1554_s15, 63 }
  0x64   : > { %s1557_s23 = sshll.u32 (!%p450_p2), %s1754_s18, 2  ;;  %s486_s29 = sand.u32 (!%p450_p2), 1, %s1734_s13  }
  0x65   : > { %p498_p4 = scmp.lt.s32.totalorder (!%p450_p2), %s1557_s23, 7  ;;  %s1560_s5 = sshll.u32 (!%p450_p2), %s1754_s18, 1 }
  0x66   : > { %s2587_s28 = scalar_lea.sflag (!%p450_p2), [#allocation4], %s486_s29 }
  0x67   : > { %v629_v0 = vld [vmem:[%s2153_s4 + $0x1e8] sm:$0xff]  ;;  %v631_v1 = vld [vmem:[%s2153_s4 + $0x1f8] sm:$0xff]  ;;  %v628_v2 = vld [vmem:[%s2153_s4 + $0x1e0] sm:$0xff]  ;;  %s2668_s15 = smov (!%p2258_p3, %s1554_s15), 63  ;;  %s2670_s23 = smov (!%p498_p4, %s1557_s23), 7 }
  0x68   : > { %718 = vmatprep.subr.mxu0 %v629_v0  ;;  %975 = vmatprep.subr.mxu1 %v631_v1  ;;  %v630_v3 = vld [vmem:[%s2153_s4 + $0x1f0] sm:$0xff]  ;;  %v625_v4 = vld [vmem:[%s2153_s4 + $0x1c8] sm:$0xff]  ;;  %v627_v5 = vld [vmem:[%s2153_s4 + $0x1d8] sm:$0xff]  ;;  %s1566_s9 = sshll.u32 %s2668_s15, 4  ;;  %s500_s27 = scalar_lea.vmem %s2646_s2, %s2670_s23 }
  0x69   : > { %719 = vmatpush1.msra.mxu0 %v628_v2  ;;  %976 = vmatpush1.msra.mxu1 %v630_v3  ;;  %v624_v6 = vld [vmem:[%s2153_s4 + $0x1c0] sm:$0xff]  ;;  %v626_v7 = vld [vmem:[%s2153_s4 + $0x1d0] sm:$0xff]  ;;  %v621_v8 = vld [vmem:[%s2153_s4 + $0x1a8] sm:$0xff]  ;;  %s2294_s22 = scalar_lea.vmem %s2644_s0, %s1566_s9  ;;  %s1567_s9 = sshll.u32 %s1750_s17, 7 }
  0x6a   : > { %720 = vmatprep.subr.mxu0 %v625_v4  ;;  %977 = vmatprep.subr.mxu1 %v627_v5  ;;  %v623_v9 = vld [vmem:[%s2153_s4 + $0x1b8] sm:$0xff]  ;;  %v620_v10 = vld [vmem:[%s2153_s4 + $0x1a0] sm:$0xff]  ;;  %v622_v11 = vld [vmem:[%s2153_s4 + $0x1b0] sm:$0xff]  ;;  %s1438_s10 = sadd.s32 %s1567_s9, %s1560_s5 }
  0x6b   : > { %721 = vmatpush1.msra.mxu0 %v624_v6  ;;  %978 = vmatpush1.msra.mxu1 %v626_v7  ;;  %v617_v12 = vld [vmem:[%s2153_s4 + $0x188] sm:$0xff]  ;;  %v619_v13 = vld [vmem:[%s2153_s4 + $0x198] sm:$0xff]  ;;  %v616_v14 = vld [vmem:[%s2153_s4 + $0x180] sm:$0xff]  ;;  %s1562_s17 = sshll.u32 %s1438_s10, 7 }
  0x6c   : > { %722 = vmatprep.subr.mxu0 %v621_v8  ;;  %979 = vmatprep.subr.mxu1 %v623_v9  ;;  %v618_v15 = vld [vmem:[%s2153_s4 + $0x190] sm:$0xff]  ;;  %v613_v16 = vld [vmem:[%s2153_s4 + $0x168] sm:$0xff]  ;;  %v615_v17 = vld [vmem:[%s2153_s4 + $0x178] sm:$0xff]  ;;  %s2579_s23 = scalar_lea.hbm %s2647_s3, %s1562_s17 }
  0x6d   : > { %723 = vmatpush1.msra.mxu0 %v620_v10  ;;  %980 = vmatpush1.msra.mxu1 %v622_v11  ;;  %v612_v18 = vld [vmem:[%s2153_s4 + $0x160] sm:$0xff]  ;;  %v614_v19 = vld [vmem:[%s2153_s4 + $0x170] sm:$0xff]  ;;  %v609_v20 = vld [vmem:[%s2153_s4 + $0x148] sm:$0xff] }
  0x6e   : > { %724 = vmatprep.subr.mxu0 %v617_v12  ;;  %981 = vmatprep.subr.mxu1 %v619_v13  ;;  %v611_v21 = vld [vmem:[%s2153_s4 + $0x158] sm:$0xff]  ;;  %v608_v22 = vld [vmem:[%s2153_s4 + $0x140] sm:$0xff]  ;;  %v610_v23 = vld [vmem:[%s2153_s4 + $0x150] sm:$0xff] }
  0x6f   : > { %725 = vmatpush1.msra.mxu0 %v616_v14  ;;  %982 = vmatpush1.msra.mxu1 %v618_v15  ;;  %v605_v24 = vld [vmem:[%s2153_s4 + $0x128] sm:$0xff]  ;;  %v607_v25 = vld [vmem:[%s2153_s4 + $0x138] sm:$0xff]  ;;  %v604_v26 = vld [vmem:[%s2153_s4 + $0x120] sm:$0xff] }
  0x70   : > { %726 = vmatprep.subr.mxu0 %v613_v16  ;;  %983 = vmatprep.subr.mxu1 %v615_v17  ;;  %v606_v27 = vld [vmem:[%s2153_s4 + $0x130] sm:$0xff]  ;;  %v601_v28 = vld [vmem:[%s2153_s4 + $0x108] sm:$0xff]  ;;  %v603_v29 = vld [vmem:[%s2153_s4 + $0x118] sm:$0xff] }
  0x71   : > { %727 = vmatpush1.msra.mxu0 %v612_v18  ;;  %984 = vmatpush1.msra.mxu1 %v614_v19  ;;  %v600_v30 = vld [vmem:[%s2153_s4 + $0x100] sm:$0xff]  ;;  %v602_v31 = vld [vmem:[%s2153_s4 + $0x110] sm:$0xff]  ;;  %v597_v32 = vld [vmem:[%s2153_s4 + $0xe8] sm:$0xff] }
  0x72   : > { %728 = vmatprep.subr.mxu0 %v609_v20  ;;  %985 = vmatprep.subr.mxu1 %v611_v21  ;;  %v599_v33 = vld [vmem:[%s2153_s4 + $0xf8] sm:$0xff]  ;;  %v596_v34 = vld [vmem:[%s2153_s4 + $0xe0] sm:$0xff]  ;;  %v598_v35 = vld [vmem:[%s2153_s4 + $0xf0] sm:$0xff] }
  0x73   : > { %729 = vmatpush1.msra.mxu0 %v608_v22  ;;  %986 = vmatpush1.msra.mxu1 %v610_v23  ;;  %v593_v36 = vld [vmem:[%s2153_s4 + $0xc8] sm:$0xff]  ;;  %v595_v37 = vld [vmem:[%s2153_s4 + $0xd8] sm:$0xff]  ;;  %v592_v38 = vld [vmem:[%s2153_s4 + $0xc0] sm:$0xff] }
  0x74   : > { %730 = vmatprep.subr.mxu0 %v605_v24  ;;  %987 = vmatprep.subr.mxu1 %v607_v25  ;;  %v594_v39 = vld [vmem:[%s2153_s4 + $0xd0] sm:$0xff]  ;;  %v589_v40 = vld [vmem:[%s2153_s4 + $0xa8] sm:$0xff]  ;;  %v591_v41 = vld [vmem:[%s2153_s4 + $0xb8] sm:$0xff] }
  0x75   : > { %731 = vmatpush1.msra.mxu0 %v604_v26  ;;  %988 = vmatpush1.msra.mxu1 %v606_v27  ;;  %v588_v42 = vld [vmem:[%s2153_s4 + $0xa0] sm:$0xff]  ;;  %v590_v43 = vld [vmem:[%s2153_s4 + $0xb0] sm:$0xff]  ;;  %v585_v44 = vld [vmem:[%s2153_s4 + $0x88] sm:$0xff] }
  0x76   : > { %732 = vmatprep.subr.mxu0 %v601_v28  ;;  %989 = vmatprep.subr.mxu1 %v603_v29  ;;  %v587_v45 = vld [vmem:[%s2153_s4 + $0x98] sm:$0xff]  ;;  %v584_v46 = vld [vmem:[%s2153_s4 + $0x80] sm:$0xff]  ;;  %v586_v47 = vld [vmem:[%s2153_s4 + $0x90] sm:$0xff] }
  0x77   : > { %733 = vmatpush1.msra.mxu0 %v600_v30  ;;  %990 = vmatpush1.msra.mxu1 %v602_v31  ;;  %v581_v48 = vld [vmem:[%s2153_s4 + $0x68] sm:$0xff]  ;;  %v583_v49 = vld [vmem:[%s2153_s4 + $0x78] sm:$0xff]  ;;  %v580_v50 = vld [vmem:[%s2153_s4 + $0x60] sm:$0xff] }
  0x78   : > { %734 = vmatprep.subr.mxu0 %v597_v32  ;;  %991 = vmatprep.subr.mxu1 %v599_v33  ;;  %v582_v51 = vld [vmem:[%s2153_s4 + $0x70] sm:$0xff]  ;;  %v577_v52 = vld [vmem:[%s2153_s4 + $0x48] sm:$0xff]  ;;  %v579_v53 = vld [vmem:[%s2153_s4 + $0x58] sm:$0xff] }
  0x79   : > { %735 = vmatpush1.msra.mxu0 %v596_v34  ;;  %992 = vmatpush1.msra.mxu1 %v598_v35  ;;  %v576_v54 = vld [vmem:[%s2153_s4 + $0x40] sm:$0xff]  ;;  %v578_v55 = vld [vmem:[%s2153_s4 + $0x50] sm:$0xff]  ;;  %v573_v56 = vld [vmem:[%s2153_s4 + $0x28] sm:$0xff] }
  0x7a   : > { %736 = vmatprep.subr.mxu0 %v593_v36  ;;  %993 = vmatprep.subr.mxu1 %v595_v37  ;;  %v575_v57 = vld [vmem:[%s2153_s4 + $0x38] sm:$0xff]  ;;  %v572_v58 = vld [vmem:[%s2153_s4 + $0x20] sm:$0xff]  ;;  %v574_v59 = vld [vmem:[%s2153_s4 + $0x30] sm:$0xff] }
  0x7b   : > { %737 = vmatpush1.msra.mxu0 %v592_v38  ;;  %994 = vmatpush1.msra.mxu1 %v594_v39  ;;  %v569_v60 = vld [vmem:[%s2153_s4 + $0x8] sm:$0xff]  ;;  %v571_v61 = vld [vmem:[%s2153_s4 + $0x18] sm:$0xff]  ;;  %v568_v62 = vld [vmem:[%s2153_s4] sm:$0xff] }
  0x7c   : > { %738 = vmatprep.subr.mxu0 %v589_v40  ;;  %995 = vmatprep.subr.mxu1 %v591_v41  ;;  %v570_v63 = vld [vmem:[%s2153_s4 + $0x10] sm:$0xff]  ;;  %v693_v0 = vld [vmem:[%s2153_s4 + $0x3e8] sm:$0xff]  ;;  %v695_v1 = vld [vmem:[%s2153_s4 + $0x3f8] sm:$0xff] }
  0x7d   : > { %739 = vmatpush1.msra.mxu0 %v588_v42  ;;  %996 = vmatpush1.msra.mxu1 %v590_v43  ;;  %v692_v2 = vld [vmem:[%s2153_s4 + $0x3e0] sm:$0xff]  ;;  %v694_v3 = vld [vmem:[%s2153_s4 + $0x3f0] sm:$0xff]  ;;  %v689_v4 = vld [vmem:[%s2153_s4 + $0x3c8] sm:$0xff] }
  0x7e   : > { %740 = vmatprep.subr.mxu0 %v585_v44  ;;  %997 = vmatprep.subr.mxu1 %v587_v45  ;;  %v691_v5 = vld [vmem:[%s2153_s4 + $0x3d8] sm:$0xff]  ;;  %v688_v6 = vld [vmem:[%s2153_s4 + $0x3c0] sm:$0xff]  ;;  %v690_v7 = vld [vmem:[%s2153_s4 + $0x3d0] sm:$0xff] }
  0x7f   : > { %741 = vmatpush1.msra.mxu0 %v584_v46  ;;  %998 = vmatpush1.msra.mxu1 %v586_v47  ;;  %v685_v8 = vld [vmem:[%s2153_s4 + $0x3a8] sm:$0xff]  ;;  %v687_v9 = vld [vmem:[%s2153_s4 + $0x3b8] sm:$0xff]  ;;  %v684_v10 = vld [vmem:[%s2153_s4 + $0x3a0] sm:$0xff] }
  0x80   : > { %742 = vmatprep.subr.mxu0 %v581_v48  ;;  %999 = vmatprep.subr.mxu1 %v583_v49  ;;  %v686_v11 = vld [vmem:[%s2153_s4 + $0x3b0] sm:$0xff]  ;;  %v681_v12 = vld [vmem:[%s2153_s4 + $0x388] sm:$0xff]  ;;  %v683_v13 = vld [vmem:[%s2153_s4 + $0x398] sm:$0xff] }
  0x81   : > { %743 = vmatpush1.msra.mxu0 %v580_v50  ;;  %1000 = vmatpush1.msra.mxu1 %v582_v51  ;;  %v680_v14 = vld [vmem:[%s2153_s4 + $0x380] sm:$0xff]  ;;  %v682_v15 = vld [vmem:[%s2153_s4 + $0x390] sm:$0xff]  ;;  %v677_v16 = vld [vmem:[%s2153_s4 + $0x368] sm:$0xff] }
  0x82   : > { %744 = vmatprep.subr.mxu0 %v577_v52  ;;  %1001 = vmatprep.subr.mxu1 %v579_v53  ;;  %v679_v17 = vld [vmem:[%s2153_s4 + $0x378] sm:$0xff]  ;;  %v676_v18 = vld [vmem:[%s2153_s4 + $0x360] sm:$0xff]  ;;  %v678_v19 = vld [vmem:[%s2153_s4 + $0x370] sm:$0xff] }
  0x83   : > { %745 = vmatpush1.msra.mxu0 %v576_v54  ;;  %1002 = vmatpush1.msra.mxu1 %v578_v55  ;;  %v673_v20 = vld [vmem:[%s2153_s4 + $0x348] sm:$0xff]  ;;  %v675_v21 = vld [vmem:[%s2153_s4 + $0x358] sm:$0xff]  ;;  %v672_v22 = vld [vmem:[%s2153_s4 + $0x340] sm:$0xff] }
  0x84   : > { %746 = vmatprep.subr.mxu0 %v573_v56  ;;  %1003 = vmatprep.subr.mxu1 %v575_v57  ;;  %v674_v23 = vld [vmem:[%s2153_s4 + $0x350] sm:$0xff]  ;;  %v669_v24 = vld [vmem:[%s2153_s4 + $0x328] sm:$0xff]  ;;  %v671_v25 = vld [vmem:[%s2153_s4 + $0x338] sm:$0xff] }
  0x85   : > { %747 = vmatpush1.msra.mxu0 %v572_v58  ;;  %1004 = vmatpush1.msra.mxu1 %v574_v59  ;;  %v668_v26 = vld [vmem:[%s2153_s4 + $0x320] sm:$0xff]  ;;  %v670_v27 = vld [vmem:[%s2153_s4 + $0x330] sm:$0xff]  ;;  %v665_v28 = vld [vmem:[%s2153_s4 + $0x308] sm:$0xff] }
  0x86   : > { %748 = vmatprep.subr.mxu0 %v569_v60  ;;  %1005 = vmatprep.subr.mxu1 %v571_v61  ;;  %v667_v29 = vld [vmem:[%s2153_s4 + $0x318] sm:$0xff]  ;;  %v664_v30 = vld [vmem:[%s2153_s4 + $0x300] sm:$0xff]  ;;  %v666_v31 = vld [vmem:[%s2153_s4 + $0x310] sm:$0xff] }
  0x87   : > { %749 = vmatpush1.msra.mxu0 %v568_v62  ;;  %1006 = vmatpush1.msra.mxu1 %v570_v63  ;;  %v661_v32 = vld [vmem:[%s2153_s4 + $0x2e8] sm:$0xff]  ;;  %v663_v33 = vld [vmem:[%s2153_s4 + $0x2f8] sm:$0xff]  ;;  %v660_v34 = vld [vmem:[%s2153_s4 + $0x2e0] sm:$0xff] }
  0x88   : > { %750 = vmatprep.subr.mxu0 %v693_v0  ;;  %1007 = vmatprep.subr.mxu1 %v695_v1  ;;  %v662_v35 = vld [vmem:[%s2153_s4 + $0x2f0] sm:$0xff]  ;;  %v657_v36 = vld [vmem:[%s2153_s4 + $0x2c8] sm:$0xff]  ;;  %v659_v37 = vld [vmem:[%s2153_s4 + $0x2d8] sm:$0xff] }
  0x89   : > { %751 = vmatpush2.msra.mxu0 %v692_v2  ;;  %1008 = vmatpush2.msra.mxu1 %v694_v3  ;;  %v656_v38 = vld [vmem:[%s2153_s4 + $0x2c0] sm:$0xff]  ;;  %v658_v39 = vld [vmem:[%s2153_s4 + $0x2d0] sm:$0xff]  ;;  %v653_v40 = vld [vmem:[%s2153_s4 + $0x2a8] sm:$0xff] }
  0x8a   : > { %752 = vmatprep.subr.mxu0 %v689_v4  ;;  %1009 = vmatprep.subr.mxu1 %v691_v5  ;;  %v655_v41 = vld [vmem:[%s2153_s4 + $0x2b8] sm:$0xff]  ;;  %v652_v42 = vld [vmem:[%s2153_s4 + $0x2a0] sm:$0xff]  ;;  %v654_v43 = vld [vmem:[%s2153_s4 + $0x2b0] sm:$0xff] }
  0x8b   : > { %753 = vmatpush2.msra.mxu0 %v688_v6  ;;  %1010 = vmatpush2.msra.mxu1 %v690_v7  ;;  %v649_v44 = vld [vmem:[%s2153_s4 + $0x288] sm:$0xff]  ;;  %v651_v45 = vld [vmem:[%s2153_s4 + $0x298] sm:$0xff]  ;;  %v648_v46 = vld [vmem:[%s2153_s4 + $0x280] sm:$0xff] }
  0x8c   : > { %754 = vmatprep.subr.mxu0 %v685_v8  ;;  %1011 = vmatprep.subr.mxu1 %v687_v9  ;;  %v650_v47 = vld [vmem:[%s2153_s4 + $0x290] sm:$0xff]  ;;  %v645_v48 = vld [vmem:[%s2153_s4 + $0x268] sm:$0xff]  ;;  %v647_v49 = vld [vmem:[%s2153_s4 + $0x278] sm:$0xff] }
  0x8d   : > { %755 = vmatpush2.msra.mxu0 %v684_v10  ;;  %1012 = vmatpush2.msra.mxu1 %v686_v11  ;;  %v644_v50 = vld [vmem:[%s2153_s4 + $0x260] sm:$0xff]  ;;  %v646_v51 = vld [vmem:[%s2153_s4 + $0x270] sm:$0xff]  ;;  %v641_v52 = vld [vmem:[%s2153_s4 + $0x248] sm:$0xff] }
  0x8e   : > { %756 = vmatprep.subr.mxu0 %v681_v12  ;;  %1013 = vmatprep.subr.mxu1 %v683_v13  ;;  %v643_v53 = vld [vmem:[%s2153_s4 + $0x258] sm:$0xff]  ;;  %v640_v54 = vld [vmem:[%s2153_s4 + $0x240] sm:$0xff]  ;;  %v642_v55 = vld [vmem:[%s2153_s4 + $0x250] sm:$0xff] }
  0x8f   : > { %757 = vmatpush2.msra.mxu0 %v680_v14  ;;  %1014 = vmatpush2.msra.mxu1 %v682_v15  ;;  %v637_v56 = vld [vmem:[%s2153_s4 + $0x228] sm:$0xff]  ;;  %v639_v57 = vld [vmem:[%s2153_s4 + $0x238] sm:$0xff]  ;;  %v636_v58 = vld [vmem:[%s2153_s4 + $0x220] sm:$0xff] }
  0x90   : > { %758 = vmatprep.subr.mxu0 %v677_v16  ;;  %1015 = vmatprep.subr.mxu1 %v679_v17  ;;  %v638_v59 = vld [vmem:[%s2153_s4 + $0x230] sm:$0xff]  ;;  %v633_v60 = vld [vmem:[%s2153_s4 + $0x208] sm:$0xff]  ;;  %v635_v61 = vld [vmem:[%s2153_s4 + $0x218] sm:$0xff] }
  0x91   : > { %759 = vmatpush2.msra.mxu0 %v676_v18  ;;  %1016 = vmatpush2.msra.mxu1 %v678_v19  ;;  %v632_v62 = vld [vmem:[%s2153_s4 + $0x200] sm:$0xff]  ;;  %v505_v63 = vld [vmem:[%s2294_s22 + $0x8] sm:$0xff]  ;;  %v634_v0 = vld [vmem:[%s2153_s4 + $0x210] sm:$0xff]  ;;  %s1553_s4 = sshll.u32 %s486_s29, 9 }
  0x92   : > { %760 = vmatprep.subr.mxu0 %v673_v20  ;;  %1017 = vmatprep.subr.mxu1 %v675_v21  ;;  %v504_v1 = vld [vmem:[%s2294_s22] sm:$0xff]  ;;  %v507_v2 = vld [vmem:[%s2294_s22 + $0x18] sm:$0xff]  ;;  %v506_v3 = vld [vmem:[%s2294_s22 + $0x10] sm:$0xff]  ;;  %s2387_s15 = scalar_lea.vmem [#allocation3], %s1553_s4 }
  0x93   : > { %761 = vmatpush2.msra.mxu0 %v672_v22  ;;  %1018 = vmatpush2.msra.mxu1 %v674_v23  ;;  %v509_v4 = vld [vmem:[%s2294_s22 + $0x28] sm:$0xff]  ;;  %v508_v5 = vld [vmem:[%s2294_s22 + $0x20] sm:$0xff]  ;;  %v511_v6 = vld [vmem:[%s2294_s22 + $0x38] sm:$0xff]  ;;  %s1441_s18 = sshll.u32 %s2387_s15, 4  ;;  %s2581_s18 = int_to_ptr.vmem [resolvable:$true] %s1441_s18 }
  0x94   : > { %762 = vmatprep.subr.mxu0 %v669_v24  ;;  %1019 = vmatprep.subr.mxu1 %v671_v25  ;;  %v510_v7 = vld [vmem:[%s2294_s22 + $0x30] sm:$0xff]  ;;  %v513_v8 = vld [vmem:[%s2294_s22 + $0x48] sm:$0xff]  ;;  %v512_v9 = vld [vmem:[%s2294_s22 + $0x40] sm:$0xff]  ;;  %s1658_s26 = scalar_lea.vmem %s2581_s18, 8192 }
  0x95   : > { %763 = vmatpush2.msra.mxu0 %v668_v26  ;;  %1020 = vmatpush2.msra.mxu1 %v670_v27  ;;  %v515_v10 = vld [vmem:[%s2294_s22 + $0x58] sm:$0xff]  ;;  %v514_v11 = vld [vmem:[%s2294_s22 + $0x50] sm:$0xff]  ;;  %v517_v12 = vld [vmem:[%s2294_s22 + $0x68] sm:$0xff]  ;;  %p1659_p5 = scmp.ne.s32.totalorder %s2581_s18, %s1658_s26 }
  0x96   : > { %764 = vmatprep.subr.mxu0 %v665_v28  ;;  %1021 = vmatprep.subr.mxu1 %v667_v29  ;;  %v516_v13 = vld [vmem:[%s2294_s22 + $0x60] sm:$0xff]  ;;  %v519_v14 = vld [vmem:[%s2294_s22 + $0x78] sm:$0xff]  ;;  %v518_v15 = vld [vmem:[%s2294_s22 + $0x70] sm:$0xff] }
  0x97   : > { %765 = vmatpush2.msra.mxu0 %v664_v30  ;;  %1022 = vmatpush2.msra.mxu1 %v666_v31  ;;  %v521_v16 = vld [vmem:[%s2294_s22 + $0x88] sm:$0xff]  ;;  %v520_v17 = vld [vmem:[%s2294_s22 + $0x80] sm:$0xff]  ;;  %v523_v18 = vld [vmem:[%s2294_s22 + $0x98] sm:$0xff]  ;;  %p1660_p6 = pnand %p1659_p5, %p1864_p7 }
  0x98   : > { %766 = vmatprep.subr.mxu0 %v661_v32  ;;  %1023 = vmatprep.subr.mxu1 %v663_v33  ;;  %v522_v19 = vld [vmem:[%s2294_s22 + $0x90] sm:$0xff]  ;;  %v525_v20 = vld [vmem:[%s2294_s22 + $0xa8] sm:$0xff]  ;;  %v524_v21 = vld [vmem:[%s2294_s22 + $0xa0] sm:$0xff] }
  0x99   : > { %767 = vmatpush2.msra.mxu0 %v660_v34  ;;  %1024 = vmatpush2.msra.mxu1 %v662_v35  ;;  %v527_v22 = vld [vmem:[%s2294_s22 + $0xb8] sm:$0xff]  ;;  %v526_v23 = vld [vmem:[%s2294_s22 + $0xb0] sm:$0xff]  ;;  %v529_v24 = vld [vmem:[%s2294_s22 + $0xc8] sm:$0xff]  ;;  %p1661_p8 = pneg %p1660_p6 }
  0x9a   : > { %768 = vmatprep.subr.mxu0 %v657_v36  ;;  %1025 = vmatprep.subr.mxu1 %v659_v37  ;;  %v528_v25 = vld [vmem:[%s2294_s22 + $0xc0] sm:$0xff]  ;;  %v531_v26 = vld [vmem:[%s2294_s22 + $0xd8] sm:$0xff]  ;;  %v530_v27 = vld [vmem:[%s2294_s22 + $0xd0] sm:$0xff] }
  0x9b   : > { %769 = vmatpush2.msra.mxu0 %v656_v38  ;;  %1026 = vmatpush2.msra.mxu1 %v658_v39  ;;  %v533_v28 = vld [vmem:[%s2294_s22 + $0xe8] sm:$0xff]  ;;  %v532_v29 = vld [vmem:[%s2294_s22 + $0xe0] sm:$0xff]  ;;  %v535_v30 = vld [vmem:[%s2294_s22 + $0xf8] sm:$0xff] }
  0x9c   : > { %770 = vmatprep.subr.mxu0 %v653_v40  ;;  %1027 = vmatprep.subr.mxu1 %v655_v41  ;;  %v534_v31 = vld [vmem:[%s2294_s22 + $0xf0] sm:$0xff]  ;;  %v537_v32 = vld [vmem:[%s2294_s22 + $0x108] sm:$0xff]  ;;  %v536_v33 = vld [vmem:[%s2294_s22 + $0x100] sm:$0xff] }
  0x9d   : > { %771 = vmatpush2.msra.mxu0 %v652_v42  ;;  %1028 = vmatpush2.msra.mxu1 %v654_v43  ;;  %v539_v34 = vld [vmem:[%s2294_s22 + $0x118] sm:$0xff]  ;;  %v538_v35 = vld [vmem:[%s2294_s22 + $0x110] sm:$0xff]  ;;  %v541_v36 = vld [vmem:[%s2294_s22 + $0x128] sm:$0xff] }
  0x9e   : > { %772 = vmatprep.subr.mxu0 %v649_v44  ;;  %1029 = vmatprep.subr.mxu1 %v651_v45  ;;  %v540_v37 = vld [vmem:[%s2294_s22 + $0x120] sm:$0xff]  ;;  %v543_v38 = vld [vmem:[%s2294_s22 + $0x138] sm:$0xff]  ;;  %v542_v39 = vld [vmem:[%s2294_s22 + $0x130] sm:$0xff] }
  0x9f   : > { %773 = vmatpush2.msra.mxu0 %v648_v46  ;;  %1030 = vmatpush2.msra.mxu1 %v650_v47  ;;  %v545_v40 = vld [vmem:[%s2294_s22 + $0x148] sm:$0xff]  ;;  %v544_v41 = vld [vmem:[%s2294_s22 + $0x140] sm:$0xff]  ;;  %v547_v42 = vld [vmem:[%s2294_s22 + $0x158] sm:$0xff] }
  0xa0   : > { %774 = vmatprep.subr.mxu0 %v645_v48  ;;  %1031 = vmatprep.subr.mxu1 %v647_v49  ;;  %v546_v43 = vld [vmem:[%s2294_s22 + $0x150] sm:$0xff]  ;;  %v549_v44 = vld [vmem:[%s2294_s22 + $0x168] sm:$0xff]  ;;  %v548_v45 = vld [vmem:[%s2294_s22 + $0x160] sm:$0xff] }
  0xa1   : > { %775 = vmatpush2.msra.mxu0 %v644_v50  ;;  %1032 = vmatpush2.msra.mxu1 %v646_v51  ;;  %v551_v46 = vld [vmem:[%s2294_s22 + $0x178] sm:$0xff]  ;;  %v550_v47 = vld [vmem:[%s2294_s22 + $0x170] sm:$0xff]  ;;  %v553_v48 = vld [vmem:[%s2294_s22 + $0x188] sm:$0xff] }
  0xa2   : > { %776 = vmatprep.subr.mxu0 %v641_v52  ;;  %1033 = vmatprep.subr.mxu1 %v643_v53  ;;  %v552_v49 = vld [vmem:[%s2294_s22 + $0x180] sm:$0xff]  ;;  %v555_v50 = vld [vmem:[%s2294_s22 + $0x198] sm:$0xff]  ;;  %v554_v51 = vld [vmem:[%s2294_s22 + $0x190] sm:$0xff] }
  0xa3   : > { %777 = vmatpush2.msra.mxu0 %v640_v54  ;;  %1034 = vmatpush2.msra.mxu1 %v642_v55  ;;  %v557_v52 = vld [vmem:[%s2294_s22 + $0x1a8] sm:$0xff]  ;;  %v556_v53 = vld [vmem:[%s2294_s22 + $0x1a0] sm:$0xff]  ;;  %v559_v54 = vld [vmem:[%s2294_s22 + $0x1b8] sm:$0xff] }
  0xa4   : > { %778 = vmatprep.subr.mxu0 %v637_v56  ;;  %1035 = vmatprep.subr.mxu1 %v639_v57  ;;  %v558_v55 = vld [vmem:[%s2294_s22 + $0x1b0] sm:$0xff]  ;;  %v561_v56 = vld [vmem:[%s2294_s22 + $0x1c8] sm:$0xff]  ;;  %v560_v57 = vld [vmem:[%s2294_s22 + $0x1c0] sm:$0xff] }
  0xa5   : > { %779 = vmatpush2.msra.mxu0 %v636_v58  ;;  %1036 = vmatpush2.msra.mxu1 %v638_v59  ;;  %v563_v58 = vld [vmem:[%s2294_s22 + $0x1d8] sm:$0xff]  ;;  %v562_v59 = vld [vmem:[%s2294_s22 + $0x1d0] sm:$0xff] }
  0xa6   : > { %780 = vmatprep.subr.mxu0 %v633_v60  ;;  %1037 = vmatprep.subr.mxu1 %v635_v61  ;;  %v565_v60 = vld [vmem:[%s2294_s22 + $0x1e8] sm:$0xff]  ;;  %v564_v61 = vld [vmem:[%s2294_s22 + $0x1e0] sm:$0xff] }
  0xa7   : > { %781 = vmatpush2.msra.mxu0 %v632_v62  ;;  %782 = vmatprep.mubr.f32.mxu0 %v505_v63  ;;  %v567_v62 = vld [vmem:[%s2294_s22 + $0x1f8] sm:$0xff] }
  0xa8   : > { %1038 = vmatpush2.msra.mxu1 %v634_v0  ;;  %1039 = vmatprep.mubr.f32.mxu1 %v505_v63  ;;  %v566_v63 = vld [vmem:[%s2294_s22 + $0x1f0] sm:$0xff]  ;;  %v698_v0 = vlaneseq }
  0xa9   : > { %783 = vmatmul.mubr.f32.vlgmr.msra.gmra.mxu0 %v504_v1  ;;  %1040 = vmatmul.mubr.f32.vlgmr.msra.gmra.mxu1 %v504_v1 }
  0xaa   : > { %788 = vmatprep.mubr.f32.mxu0 %v507_v2  ;;  %1045 = vmatprep.mubr.f32.mxu1 %v507_v2  ;;  %v699_v1 = vshrl.u32 %v698_v0, 7 }
  0xac   : > { %v700_v2 = vsub.s32 0, %v699_v1 }
  0xad   : > { %789 = vmatmul.mubr.f32.gmra.mxu0 %v506_v3  ;;  %1046 = vmatmul.mubr.f32.gmra.mxu1 %v506_v3  ;;  %v708_v3 = vsub.s32 2, %v699_v1 }
  0xae   : > { %794 = vmatprep.mubr.f32.mxu0 %v509_v4  ;;  %1051 = vmatprep.mubr.f32.mxu1 %v509_v4  ;;  %v696_v4 = vld [vmem:[%s500_s27] sm:$0xf]  ;;  %s1768_s27 = smov [#allocation3]  }
  0xaf   : > { %s1662_s4 = sshll.u32 %s1768_s27, 4  ;;  %s1663_s4 = int_to_ptr.vmem [resolvable:$false] %s1662_s4 }
  0xb0   : > { %s1664_s5 = scalar_lea.vmem %s1663_s4, 16384  ;;  %p1665_p9 = scmp.lt.s32.totalorder %s2581_s18, %s1663_s4 }
  0xb1   : > { %795 = vmatmul.mubr.f32.gmra.mxu0 %v508_v5  ;;  %1052 = vmatmul.mubr.f32.gmra.mxu1 %v508_v5  ;;  %v712_v5 = vsub.s32 3, %v699_v1  ;;  %p1666_p10 = scmp.lt.s32.totalorder %s1664_s5, %s1658_s26 }
  0xb2   : > { %800 = vmatprep.mubr.f32.mxu0 %v511_v6  ;;  %1057 = vmatprep.mubr.f32.mxu1 %v511_v6  ;;  %v704_v6 = vsub.s32 1, %v699_v1 }
  0xb3   : > { %p1667_p11 = por %p1666_p10, %p1665_p9 }
  0xb5   : > { %801 = vmatmul.mubr.f32.gmra.mxu0 %v510_v7  ;;  %1058 = vmatmul.mubr.f32.gmra.mxu1 %v510_v7  ;;  %v2370_v7 = vrot.slane %v696_v4, %v700_v2  ;;  %p1668_p13 = pnand %p1667_p11, %p1661_p8 }
  0xb6   : > { %806 = vmatprep.mubr.f32.mxu0 %v513_v8  ;;  %1063 = vmatprep.mubr.f32.mxu1 %v513_v8  ;;  %v2372_v8 = vrot.slane %v696_v4, %v708_v3 }
  0xb9   : > { %807 = vmatmul.mubr.f32.gmra.mxu0 %v512_v9  ;;  %1064 = vmatmul.mubr.f32.gmra.mxu1 %v512_v9  ;;  %v2375_v9 = vrot.slane %v696_v4, %v712_v5 }
  0xba   : > { %812 = vmatprep.mubr.f32.mxu0 %v515_v10  ;;  %1069 = vmatprep.mubr.f32.mxu1 %v515_v10 }
  0xbd   : > { %813 = vmatmul.mubr.f32.gmra.mxu0 %v514_v11  ;;  %1070 = vmatmul.mubr.f32.gmra.mxu1 %v514_v11 }
  0xbe   : > { %818 = vmatprep.mubr.f32.mxu0 %v517_v12  ;;  %1075 = vmatprep.mubr.f32.mxu1 %v517_v12  ;;  %v2377_v12 = vrot.slane %v696_v4, %v704_v6 }
  0xc1   : > { %819 = vmatmul.mubr.f32.gmra.mxu0 %v516_v13  ;;  %1076 = vmatmul.mubr.f32.gmra.mxu1 %v516_v13 }
  0xc2   : > { %824 = vmatprep.mubr.f32.mxu0 %v519_v14  ;;  %1081 = vmatprep.mubr.f32.mxu1 %v519_v14 }
  0xc5   : > { %825 = vmatmul.mubr.f32.gmra.mxu0 %v518_v15  ;;  %1082 = vmatmul.mubr.f32.gmra.mxu1 %v518_v15 }
  0xc6   : > { %830 = vmatprep.mubr.f32.mxu0 %v521_v16  ;;  %1087 = vmatprep.mubr.f32.mxu1 %v521_v16 }
  0xc9   : > { %831 = vmatmul.mubr.f32.gmra.mxu0 %v520_v17  ;;  %1088 = vmatmul.mubr.f32.gmra.mxu1 %v520_v17 }
  0xca   : > { %836 = vmatprep.mubr.f32.mxu0 %v523_v18  ;;  %1093 = vmatprep.mubr.f32.mxu1 %v523_v18 }
  0xcd   : > { %837 = vmatmul.mubr.f32.gmra.mxu0 %v522_v19  ;;  %1094 = vmatmul.mubr.f32.gmra.mxu1 %v522_v19 }
  0xce   : > { %842 = vmatprep.mubr.f32.mxu0 %v525_v20  ;;  %1099 = vmatprep.mubr.f32.mxu1 %v525_v20 }
  0xd1   : > { %843 = vmatmul.mubr.f32.gmra.mxu0 %v524_v21  ;;  %1100 = vmatmul.mubr.f32.gmra.mxu1 %v524_v21 }
  0xd2   : > { %848 = vmatprep.mubr.f32.mxu0 %v527_v22  ;;  %1105 = vmatprep.mubr.f32.mxu1 %v527_v22 }
  0xd5   : > { %849 = vmatmul.mubr.f32.gmra.mxu0 %v526_v23  ;;  %1106 = vmatmul.mubr.f32.gmra.mxu1 %v526_v23 }
  0xd6   : > { %854 = vmatprep.mubr.f32.mxu0 %v529_v24  ;;  %1111 = vmatprep.mubr.f32.mxu1 %v529_v24 }
  0xd9   : > { %855 = vmatmul.mubr.f32.gmra.mxu0 %v528_v25  ;;  %1112 = vmatmul.mubr.f32.gmra.mxu1 %v528_v25 }
  0xda   : > { %860 = vmatprep.mubr.f32.mxu0 %v531_v26  ;;  %1117 = vmatprep.mubr.f32.mxu1 %v531_v26 }
  0xdd   : > { %861 = vmatmul.mubr.f32.gmra.mxu0 %v530_v27  ;;  %1118 = vmatmul.mubr.f32.gmra.mxu1 %v530_v27 }
  0xde   : > { %866 = vmatprep.mubr.f32.mxu0 %v533_v28  ;;  %1123 = vmatprep.mubr.f32.mxu1 %v533_v28 }
  0xe1   : > { %867 = vmatmul.mubr.f32.gmra.mxu0 %v532_v29  ;;  %1124 = vmatmul.mubr.f32.gmra.mxu1 %v532_v29 }
  0xe2   : > { %872 = vmatprep.mubr.f32.mxu0 %v535_v30  ;;  %1129 = vmatprep.mubr.f32.mxu1 %v535_v30 }
  0xe5   : > { %873 = vmatmul.mubr.f32.gmra.mxu0 %v534_v31  ;;  %1130 = vmatmul.mubr.f32.gmra.mxu1 %v534_v31 }
  0xe6   : > { %878 = vmatprep.mubr.f32.mxu0 %v537_v32  ;;  %1135 = vmatprep.mubr.f32.mxu1 %v537_v32 }
  0xe9   : > { %879 = vmatmul.mubr.f32.gmra.mxu0 %v536_v33  ;;  %1136 = vmatmul.mubr.f32.gmra.mxu1 %v536_v33 }
  0xea   : > { %884 = vmatprep.mubr.f32.mxu0 %v539_v34  ;;  %1141 = vmatprep.mubr.f32.mxu1 %v539_v34 }
  0xed   : > { %885 = vmatmul.mubr.f32.gmra.mxu0 %v538_v35  ;;  %1142 = vmatmul.mubr.f32.gmra.mxu1 %v538_v35 }
  0xee   : > { %890 = vmatprep.mubr.f32.mxu0 %v541_v36  ;;  %1147 = vmatprep.mubr.f32.mxu1 %v541_v36 }
  0xf1   : > { %891 = vmatmul.mubr.f32.gmra.mxu0 %v540_v37  ;;  %1148 = vmatmul.mubr.f32.gmra.mxu1 %v540_v37 }
  0xf2   : > { %896 = vmatprep.mubr.f32.mxu0 %v543_v38  ;;  %1153 = vmatprep.mubr.f32.mxu1 %v543_v38 }
  0xf5   : > { %897 = vmatmul.mubr.f32.gmra.mxu0 %v542_v39  ;;  %1154 = vmatmul.mubr.f32.gmra.mxu1 %v542_v39 }
  0xf6   : > { %902 = vmatprep.mubr.f32.mxu0 %v545_v40  ;;  %1159 = vmatprep.mubr.f32.mxu1 %v545_v40 }
  0xf9   : > { %903 = vmatmul.mubr.f32.gmra.mxu0 %v544_v41  ;;  %1160 = vmatmul.mubr.f32.gmra.mxu1 %v544_v41 }
  0xfa   : > { %908 = vmatprep.mubr.f32.mxu0 %v547_v42  ;;  %1165 = vmatprep.mubr.f32.mxu1 %v547_v42 }
  0xfd   : > { %909 = vmatmul.mubr.f32.gmra.mxu0 %v546_v43  ;;  %1166 = vmatmul.mubr.f32.gmra.mxu1 %v546_v43 }
  0xfe   : > { %914 = vmatprep.mubr.f32.mxu0 %v549_v44  ;;  %1171 = vmatprep.mubr.f32.mxu1 %v549_v44 }
 0x101   : > { %915 = vmatmul.mubr.f32.gmra.mxu0 %v548_v45  ;;  %1172 = vmatmul.mubr.f32.gmra.mxu1 %v548_v45 }
 0x102   : > { %920 = vmatprep.mubr.f32.mxu0 %v551_v46  ;;  %1177 = vmatprep.mubr.f32.mxu1 %v551_v46 }
 0x105   : > { %921 = vmatmul.mubr.f32.gmra.mxu0 %v550_v47  ;;  %1178 = vmatmul.mubr.f32.gmra.mxu1 %v550_v47 }
 0x106   : > { %926 = vmatprep.mubr.f32.mxu0 %v553_v48  ;;  %1183 = vmatprep.mubr.f32.mxu1 %v553_v48 }
 0x109   : > { %927 = vmatmul.mubr.f32.gmra.mxu0 %v552_v49  ;;  %1184 = vmatmul.mubr.f32.gmra.mxu1 %v552_v49 }
 0x10a   : > { %932 = vmatprep.mubr.f32.mxu0 %v555_v50  ;;  %1189 = vmatprep.mubr.f32.mxu1 %v555_v50 }
 0x10d   : > { %933 = vmatmul.mubr.f32.gmra.mxu0 %v554_v51  ;;  %1190 = vmatmul.mubr.f32.gmra.mxu1 %v554_v51 }
 0x10e   : > { %938 = vmatprep.mubr.f32.mxu0 %v557_v52  ;;  %1195 = vmatprep.mubr.f32.mxu1 %v557_v52 }
 0x111   : > { %939 = vmatmul.mubr.f32.gmra.mxu0 %v556_v53  ;;  %1196 = vmatmul.mubr.f32.gmra.mxu1 %v556_v53 }
 0x112   : > { %944 = vmatprep.mubr.f32.mxu0 %v559_v54  ;;  %1201 = vmatprep.mubr.f32.mxu1 %v559_v54 }
 0x115   : > { %945 = vmatmul.mubr.f32.gmra.mxu0 %v558_v55  ;;  %1202 = vmatmul.mubr.f32.gmra.mxu1 %v558_v55 }
 0x116   : > { %950 = vmatprep.mubr.f32.mxu0 %v561_v56  ;;  %1207 = vmatprep.mubr.f32.mxu1 %v561_v56 }
 0x119   : > { %951 = vmatmul.mubr.f32.gmra.mxu0 %v560_v57  ;;  %1208 = vmatmul.mubr.f32.gmra.mxu1 %v560_v57 }
 0x11a   : > { %956 = vmatprep.mubr.f32.mxu0 %v563_v58  ;;  %1213 = vmatprep.mubr.f32.mxu1 %v563_v58 }
 0x11d   : > { %957 = vmatmul.mubr.f32.gmra.mxu0 %v562_v59  ;;  %1214 = vmatmul.mubr.f32.gmra.mxu1 %v562_v59 }
 0x11e   : > { %962 = vmatprep.mubr.f32.mxu0 %v565_v60  ;;  %1219 = vmatprep.mubr.f32.mxu1 %v565_v60 }
 0x121   : > { %963 = vmatmul.mubr.f32.gmra.mxu0 %v564_v61  ;;  %1220 = vmatmul.mubr.f32.gmra.mxu1 %v564_v61 }
 0x122   : > { %968 = vmatprep.mubr.f32.mxu0 %v567_v62  ;;  %1225 = vmatprep.mubr.f32.mxu1 %v567_v62 }
 0x125   : > { %969 = vmatmul.mubr.f32.gmra.mxu0 %v566_v63  ;;  %1226 = vmatmul.mubr.f32.gmra.mxu1 %v566_v63 }
 0x169   : > { %v784_v10 = vpop.f32.mrf.mxu0  ;;  %v1041_v11 = vpop.f32.mrf.mxu1 }
 0x16a   : > { %v785_v13 = vadd.f32 %v784_v10, %v2370_v7  ;;  %v1042_v14 = vadd.f32 %v1041_v11, %v2372_v8 }
 0x16b   : > { %v786_v15 = vpop.f32.mrf.mxu0  ;;  %v1043_v16 = vpop.f32.mrf.mxu1 }
 0x16c   : > { %v1232_v17 = vmax.f32 %v1042_v14, 0.0  ;;  %v1044_v18 = vadd.f32 %v1043_v16, %v2375_v9  ;;  %v787_v19 = vadd.f32 %v786_v15, %v2377_v12 }
 0x16d   : > { %v790_v20 = vpop.f32.mrf.mxu0  ;;  %v1047_v21 = vpop.f32.mrf.mxu1 }
 0x16e   : > { %v1296_v22 = vadd.f32 %v1232_v17, %v785_v13  ;;  %v1233_v23 = vmax.f32 %v1044_v18, 0.0  ;;  %v791_v24 = vadd.f32 %v790_v20, %v2370_v7  ;;  %v1048_v25 = vadd.f32 %v1047_v21, %v2372_v8 }
 0x16f   : > { %v792_v26 = vpop.f32.mrf.mxu0  ;;  %v1049_v27 = vpop.f32.mrf.mxu1 }
 0x170   : > { %1360 = vst [vmem:[%s2387_s15] sm:$0xff] %v1296_v22  ;;  %v1297_v28 = vadd.f32 %v1233_v23, %v787_v19  ;;  %v1234_v29 = vmax.f32 %v1048_v25, 0.0  ;;  %v1050_v30 = vadd.f32 %v1049_v27, %v2375_v9  ;;  %v793_v31 = vadd.f32 %v792_v26, %v2377_v12 }
 0x171   : > { %v796_v32 = vpop.f32.mrf.mxu0  ;;  %v1053_v33 = vpop.f32.mrf.mxu1 }
 0x172   : > { %1361 = vst [vmem:[%s2387_s15 + $0x8] sm:$0xff] %v1297_v28  ;;  %v1298_v34 = vadd.f32 %v1234_v29, %v791_v24  ;;  %v1235_v35 = vmax.f32 %v1050_v30, 0.0  ;;  %v797_v36 = vadd.f32 %v796_v32, %v2370_v7  ;;  %v1054_v37 = vadd.f32 %v1053_v33, %v2372_v8 }
 0x173   : > { %v798_v38 = vpop.f32.mrf.mxu0  ;;  %v1055_v39 = vpop.f32.mrf.mxu1 }
 0x174   : > { %1362 = vst [vmem:[%s2387_s15 + $0x10] sm:$0xff] %v1298_v34  ;;  %v1299_v40 = vadd.f32 %v1235_v35, %v793_v31  ;;  %v1236_v41 = vmax.f32 %v1054_v37, 0.0  ;;  %v1056_v42 = vadd.f32 %v1055_v39, %v2375_v9  ;;  %v799_v43 = vadd.f32 %v798_v38, %v2377_v12 }
 0x175   : > { %v802_v44 = vpop.f32.mrf.mxu0  ;;  %v1059_v45 = vpop.f32.mrf.mxu1 }
 0x176   : > { %1363 = vst [vmem:[%s2387_s15 + $0x18] sm:$0xff] %v1299_v40  ;;  %v1300_v46 = vadd.f32 %v1236_v41, %v797_v36  ;;  %v1237_v47 = vmax.f32 %v1056_v42, 0.0  ;;  %v803_v48 = vadd.f32 %v802_v44, %v2370_v7  ;;  %v1060_v49 = vadd.f32 %v1059_v45, %v2372_v8 }
 0x177   : > { %v804_v50 = vpop.f32.mrf.mxu0  ;;  %v1061_v51 = vpop.f32.mrf.mxu1 }
 0x178   : > { %1364 = vst [vmem:[%s2387_s15 + $0x20] sm:$0xff] %v1300_v46  ;;  %v1301_v52 = vadd.f32 %v1237_v47, %v799_v43  ;;  %v1238_v53 = vmax.f32 %v1060_v49, 0.0  ;;  %v1062_v54 = vadd.f32 %v1061_v51, %v2375_v9  ;;  %v805_v55 = vadd.f32 %v804_v50, %v2377_v12 }
 0x179   : > { %v808_v56 = vpop.f32.mrf.mxu0  ;;  %v1065_v57 = vpop.f32.mrf.mxu1 }
 0x17a   : > { %1365 = vst [vmem:[%s2387_s15 + $0x28] sm:$0xff] %v1301_v52  ;;  %v1302_v58 = vadd.f32 %v1238_v53, %v803_v48  ;;  %v1239_v59 = vmax.f32 %v1062_v54, 0.0  ;;  %v809_v60 = vadd.f32 %v808_v56, %v2370_v7  ;;  %v1066_v61 = vadd.f32 %v1065_v57, %v2372_v8 }
 0x17b   : > { %v810_v62 = vpop.f32.mrf.mxu0  ;;  %v1067_v63 = vpop.f32.mrf.mxu1 }
 0x17c   : > { %1366 = vst [vmem:[%s2387_s15 + $0x30] sm:$0xff] %v1302_v58  ;;  %v1303_v0 = vadd.f32 %v1239_v59, %v805_v55  ;;  %v1240_v1 = vmax.f32 %v1066_v61, 0.0  ;;  %v1068_v2 = vadd.f32 %v1067_v63, %v2375_v9  ;;  %v811_v3 = vadd.f32 %v810_v62, %v2377_v12 }
 0x17d   : > { %v814_v4 = vpop.f32.mrf.mxu0  ;;  %v1071_v5 = vpop.f32.mrf.mxu1 }
 0x17e   : > { %1367 = vst [vmem:[%s2387_s15 + $0x38] sm:$0xff] %v1303_v0  ;;  %v1304_v6 = vadd.f32 %v1240_v1, %v809_v60  ;;  %v1241_v10 = vmax.f32 %v1068_v2, 0.0  ;;  %v815_v11 = vadd.f32 %v814_v4, %v2370_v7  ;;  %v1072_v13 = vadd.f32 %v1071_v5, %v2372_v8 }
 0x17f   : > { %v816_v14 = vpop.f32.mrf.mxu0  ;;  %v1073_v15 = vpop.f32.mrf.mxu1 }
 0x180   : > { %1368 = vst [vmem:[%s2387_s15 + $0x40] sm:$0xff] %v1304_v6  ;;  %v1305_v16 = vadd.f32 %v1241_v10, %v811_v3  ;;  %v1242_v17 = vmax.f32 %v1072_v13, 0.0  ;;  %v1074_v18 = vadd.f32 %v1073_v15, %v2375_v9  ;;  %v817_v19 = vadd.f32 %v816_v14, %v2377_v12 }
 0x181   : > { %v820_v20 = vpop.f32.mrf.mxu0  ;;  %v1077_v21 = vpop.f32.mrf.mxu1 }
 0x182   : > { %1369 = vst [vmem:[%s2387_s15 + $0x48] sm:$0xff] %v1305_v16  ;;  %v1306_v22 = vadd.f32 %v1242_v17, %v815_v11  ;;  %v1243_v23 = vmax.f32 %v1074_v18, 0.0  ;;  %v821_v24 = vadd.f32 %v820_v20, %v2370_v7  ;;  %v1078_v25 = vadd.f32 %v1077_v21, %v2372_v8 }
 0x183   : > { %v822_v26 = vpop.f32.mrf.mxu0  ;;  %v1079_v27 = vpop.f32.mrf.mxu1 }
 0x184   : > { %1370 = vst [vmem:[%s2387_s15 + $0x50] sm:$0xff] %v1306_v22  ;;  %v1307_v28 = vadd.f32 %v1243_v23, %v817_v19  ;;  %v1244_v29 = vmax.f32 %v1078_v25, 0.0  ;;  %v1080_v30 = vadd.f32 %v1079_v27, %v2375_v9  ;;  %v823_v31 = vadd.f32 %v822_v26, %v2377_v12 }
 0x185   : > { %v826_v32 = vpop.f32.mrf.mxu0  ;;  %v1083_v33 = vpop.f32.mrf.mxu1 }
 0x186   : > { %1371 = vst [vmem:[%s2387_s15 + $0x58] sm:$0xff] %v1307_v28  ;;  %v1308_v34 = vadd.f32 %v1244_v29, %v821_v24  ;;  %v1245_v35 = vmax.f32 %v1080_v30, 0.0  ;;  %v827_v36 = vadd.f32 %v826_v32, %v2370_v7  ;;  %v1084_v37 = vadd.f32 %v1083_v33, %v2372_v8 }
 0x187   : > { %v828_v38 = vpop.f32.mrf.mxu0  ;;  %v1085_v39 = vpop.f32.mrf.mxu1 }
 0x188   : > { %1372 = vst [vmem:[%s2387_s15 + $0x60] sm:$0xff] %v1308_v34  ;;  %v1309_v40 = vadd.f32 %v1245_v35, %v823_v31  ;;  %v1246_v41 = vmax.f32 %v1084_v37, 0.0  ;;  %v1086_v42 = vadd.f32 %v1085_v39, %v2375_v9  ;;  %v829_v43 = vadd.f32 %v828_v38, %v2377_v12 }
 0x189   : > { %v832_v44 = vpop.f32.mrf.mxu0  ;;  %v1089_v45 = vpop.f32.mrf.mxu1 }
 0x18a   : > { %1373 = vst [vmem:[%s2387_s15 + $0x68] sm:$0xff] %v1309_v40  ;;  %v1310_v46 = vadd.f32 %v1246_v41, %v827_v36  ;;  %v1247_v47 = vmax.f32 %v1086_v42, 0.0  ;;  %v833_v48 = vadd.f32 %v832_v44, %v2370_v7  ;;  %v1090_v49 = vadd.f32 %v1089_v45, %v2372_v8 }
 0x18b   : > { %v834_v50 = vpop.f32.mrf.mxu0  ;;  %v1091_v51 = vpop.f32.mrf.mxu1 }
 0x18c   : > { %1374 = vst [vmem:[%s2387_s15 + $0x70] sm:$0xff] %v1310_v46  ;;  %v1311_v52 = vadd.f32 %v1247_v47, %v829_v43  ;;  %v1248_v53 = vmax.f32 %v1090_v49, 0.0  ;;  %v1092_v54 = vadd.f32 %v1091_v51, %v2375_v9  ;;  %v835_v55 = vadd.f32 %v834_v50, %v2377_v12 }
 0x18d   : > { %v838_v56 = vpop.f32.mrf.mxu0  ;;  %v1095_v57 = vpop.f32.mrf.mxu1 }
 0x18e   : > { %1375 = vst [vmem:[%s2387_s15 + $0x78] sm:$0xff] %v1311_v52  ;;  %v1312_v58 = vadd.f32 %v1248_v53, %v833_v48  ;;  %v1249_v59 = vmax.f32 %v1092_v54, 0.0  ;;  %v839_v60 = vadd.f32 %v838_v56, %v2370_v7  ;;  %v1096_v61 = vadd.f32 %v1095_v57, %v2372_v8 }
 0x18f   : > { %v840_v62 = vpop.f32.mrf.mxu0  ;;  %v1097_v63 = vpop.f32.mrf.mxu1 }
 0x190   : > { %1376 = vst [vmem:[%s2387_s15 + $0x80] sm:$0xff] %v1312_v58  ;;  %v1313_v0 = vadd.f32 %v1249_v59, %v835_v55  ;;  %v1250_v1 = vmax.f32 %v1096_v61, 0.0  ;;  %v1098_v2 = vadd.f32 %v1097_v63, %v2375_v9  ;;  %v841_v3 = vadd.f32 %v840_v62, %v2377_v12 }
 0x191   : > { %v844_v4 = vpop.f32.mrf.mxu0  ;;  %v1101_v5 = vpop.f32.mrf.mxu1 }
 0x192   : > { %1377 = vst [vmem:[%s2387_s15 + $0x88] sm:$0xff] %v1313_v0  ;;  %v1314_v6 = vadd.f32 %v1250_v1, %v839_v60  ;;  %v1251_v10 = vmax.f32 %v1098_v2, 0.0  ;;  %v845_v11 = vadd.f32 %v844_v4, %v2370_v7  ;;  %v1102_v13 = vadd.f32 %v1101_v5, %v2372_v8 }
 0x193   : > { %v846_v14 = vpop.f32.mrf.mxu0  ;;  %v1103_v15 = vpop.f32.mrf.mxu1 }
 0x194   : > { %1378 = vst [vmem:[%s2387_s15 + $0x90] sm:$0xff] %v1314_v6  ;;  %v1315_v16 = vadd.f32 %v1251_v10, %v841_v3  ;;  %v1252_v17 = vmax.f32 %v1102_v13, 0.0  ;;  %v1104_v18 = vadd.f32 %v1103_v15, %v2375_v9  ;;  %v847_v19 = vadd.f32 %v846_v14, %v2377_v12 }
 0x195   : > { %v850_v20 = vpop.f32.mrf.mxu0  ;;  %v1107_v21 = vpop.f32.mrf.mxu1 }
 0x196   : > { %1379 = vst [vmem:[%s2387_s15 + $0x98] sm:$0xff] %v1315_v16  ;;  %v1316_v22 = vadd.f32 %v1252_v17, %v845_v11  ;;  %v1253_v23 = vmax.f32 %v1104_v18, 0.0  ;;  %v851_v24 = vadd.f32 %v850_v20, %v2370_v7  ;;  %v1108_v25 = vadd.f32 %v1107_v21, %v2372_v8 }
 0x197   : > { %v852_v26 = vpop.f32.mrf.mxu0  ;;  %v1109_v27 = vpop.f32.mrf.mxu1 }
 0x198   : > { %1380 = vst [vmem:[%s2387_s15 + $0xa0] sm:$0xff] %v1316_v22  ;;  %v1317_v28 = vadd.f32 %v1253_v23, %v847_v19  ;;  %v1254_v29 = vmax.f32 %v1108_v25, 0.0  ;;  %v1110_v30 = vadd.f32 %v1109_v27, %v2375_v9  ;;  %v853_v31 = vadd.f32 %v852_v26, %v2377_v12 }
 0x199   : > { %v856_v32 = vpop.f32.mrf.mxu0  ;;  %v1113_v33 = vpop.f32.mrf.mxu1 }
 0x19a   : > { %1381 = vst [vmem:[%s2387_s15 + $0xa8] sm:$0xff] %v1317_v28  ;;  %v1318_v34 = vadd.f32 %v1254_v29, %v851_v24  ;;  %v1255_v35 = vmax.f32 %v1110_v30, 0.0  ;;  %v857_v36 = vadd.f32 %v856_v32, %v2370_v7  ;;  %v1114_v37 = vadd.f32 %v1113_v33, %v2372_v8 }
 0x19b   : > { %v858_v38 = vpop.f32.mrf.mxu0  ;;  %v1115_v39 = vpop.f32.mrf.mxu1 }
 0x19c   : > { %1382 = vst [vmem:[%s2387_s15 + $0xb0] sm:$0xff] %v1318_v34  ;;  %v1319_v40 = vadd.f32 %v1255_v35, %v853_v31  ;;  %v1256_v41 = vmax.f32 %v1114_v37, 0.0  ;;  %v1116_v42 = vadd.f32 %v1115_v39, %v2375_v9  ;;  %v859_v43 = vadd.f32 %v858_v38, %v2377_v12 }
 0x19d   : > { %v862_v44 = vpop.f32.mrf.mxu0  ;;  %v1119_v45 = vpop.f32.mrf.mxu1 }
 0x19e   : > { %1383 = vst [vmem:[%s2387_s15 + $0xb8] sm:$0xff] %v1319_v40  ;;  %v1320_v46 = vadd.f32 %v1256_v41, %v857_v36  ;;  %v1257_v47 = vmax.f32 %v1116_v42, 0.0  ;;  %v863_v48 = vadd.f32 %v862_v44, %v2370_v7  ;;  %v1120_v49 = vadd.f32 %v1119_v45, %v2372_v8 }
 0x19f   : > { %v864_v50 = vpop.f32.mrf.mxu0  ;;  %v1121_v51 = vpop.f32.mrf.mxu1 }
 0x1a0   : > { %1384 = vst [vmem:[%s2387_s15 + $0xc0] sm:$0xff] %v1320_v46  ;;  %v1321_v52 = vadd.f32 %v1257_v47, %v859_v43  ;;  %v1258_v53 = vmax.f32 %v1120_v49, 0.0  ;;  %v1122_v54 = vadd.f32 %v1121_v51, %v2375_v9  ;;  %v865_v55 = vadd.f32 %v864_v50, %v2377_v12 }
 0x1a1   : > { %v868_v56 = vpop.f32.mrf.mxu0  ;;  %v1125_v57 = vpop.f32.mrf.mxu1 }
 0x1a2   : > { %1385 = vst [vmem:[%s2387_s15 + $0xc8] sm:$0xff] %v1321_v52  ;;  %v1322_v58 = vadd.f32 %v1258_v53, %v863_v48  ;;  %v1259_v59 = vmax.f32 %v1122_v54, 0.0  ;;  %v869_v60 = vadd.f32 %v868_v56, %v2370_v7  ;;  %v1126_v61 = vadd.f32 %v1125_v57, %v2372_v8 }
 0x1a3   : > { %v870_v62 = vpop.f32.mrf.mxu0  ;;  %v1127_v63 = vpop.f32.mrf.mxu1 }
 0x1a4   : > { %1386 = vst [vmem:[%s2387_s15 + $0xd0] sm:$0xff] %v1322_v58  ;;  %v1323_v0 = vadd.f32 %v1259_v59, %v865_v55  ;;  %v1260_v1 = vmax.f32 %v1126_v61, 0.0  ;;  %v1128_v2 = vadd.f32 %v1127_v63, %v2375_v9  ;;  %v871_v3 = vadd.f32 %v870_v62, %v2377_v12 }
 0x1a5   : > { %v874_v4 = vpop.f32.mrf.mxu0  ;;  %v1131_v5 = vpop.f32.mrf.mxu1 }
 0x1a6   : > { %1387 = vst [vmem:[%s2387_s15 + $0xd8] sm:$0xff] %v1323_v0  ;;  %v1324_v6 = vadd.f32 %v1260_v1, %v869_v60  ;;  %v1261_v10 = vmax.f32 %v1128_v2, 0.0  ;;  %v875_v11 = vadd.f32 %v874_v4, %v2370_v7  ;;  %v1132_v13 = vadd.f32 %v1131_v5, %v2372_v8 }
 0x1a7   : > { %v876_v14 = vpop.f32.mrf.mxu0  ;;  %v1133_v15 = vpop.f32.mrf.mxu1 }
 0x1a8   : > { %1388 = vst [vmem:[%s2387_s15 + $0xe0] sm:$0xff] %v1324_v6  ;;  %v1325_v16 = vadd.f32 %v1261_v10, %v871_v3  ;;  %v1262_v17 = vmax.f32 %v1132_v13, 0.0  ;;  %v1134_v18 = vadd.f32 %v1133_v15, %v2375_v9  ;;  %v877_v19 = vadd.f32 %v876_v14, %v2377_v12 }
 0x1a9   : > { %v880_v20 = vpop.f32.mrf.mxu0  ;;  %v1137_v21 = vpop.f32.mrf.mxu1 }
 0x1aa   : > { %1389 = vst [vmem:[%s2387_s15 + $0xe8] sm:$0xff] %v1325_v16  ;;  %v1326_v22 = vadd.f32 %v1262_v17, %v875_v11  ;;  %v1263_v23 = vmax.f32 %v1134_v18, 0.0  ;;  %v881_v24 = vadd.f32 %v880_v20, %v2370_v7  ;;  %v1138_v25 = vadd.f32 %v1137_v21, %v2372_v8 }
 0x1ab   : > { %v882_v26 = vpop.f32.mrf.mxu0  ;;  %v1139_v27 = vpop.f32.mrf.mxu1 }
 0x1ac   : > { %1390 = vst [vmem:[%s2387_s15 + $0xf0] sm:$0xff] %v1326_v22  ;;  %v1327_v28 = vadd.f32 %v1263_v23, %v877_v19  ;;  %v1264_v29 = vmax.f32 %v1138_v25, 0.0  ;;  %v1140_v30 = vadd.f32 %v1139_v27, %v2375_v9  ;;  %v883_v31 = vadd.f32 %v882_v26, %v2377_v12 }
 0x1ad   : > { %v886_v32 = vpop.f32.mrf.mxu0  ;;  %v1143_v33 = vpop.f32.mrf.mxu1 }
 0x1ae   : > { %1391 = vst [vmem:[%s2387_s15 + $0xf8] sm:$0xff] %v1327_v28  ;;  %v1328_v34 = vadd.f32 %v1264_v29, %v881_v24  ;;  %v1265_v35 = vmax.f32 %v1140_v30, 0.0  ;;  %v887_v36 = vadd.f32 %v886_v32, %v2370_v7  ;;  %v1144_v37 = vadd.f32 %v1143_v33, %v2372_v8 }
 0x1af   : > { %v888_v38 = vpop.f32.mrf.mxu0  ;;  %v1145_v39 = vpop.f32.mrf.mxu1 }
 0x1b0   : > { %1392 = vst [vmem:[%s2387_s15 + $0x100] sm:$0xff] %v1328_v34  ;;  %v1329_v40 = vadd.f32 %v1265_v35, %v883_v31  ;;  %v1266_v41 = vmax.f32 %v1144_v37, 0.0  ;;  %v1146_v42 = vadd.f32 %v1145_v39, %v2375_v9  ;;  %v889_v43 = vadd.f32 %v888_v38, %v2377_v12 }
 0x1b1   : > { %v892_v44 = vpop.f32.mrf.mxu0  ;;  %v1149_v45 = vpop.f32.mrf.mxu1 }
 0x1b2   : > { %1393 = vst [vmem:[%s2387_s15 + $0x108] sm:$0xff] %v1329_v40  ;;  %v1330_v46 = vadd.f32 %v1266_v41, %v887_v36  ;;  %v1267_v47 = vmax.f32 %v1146_v42, 0.0  ;;  %v893_v48 = vadd.f32 %v892_v44, %v2370_v7  ;;  %v1150_v49 = vadd.f32 %v1149_v45, %v2372_v8 }
 0x1b3   : > { %v894_v50 = vpop.f32.mrf.mxu0  ;;  %v1151_v51 = vpop.f32.mrf.mxu1 }
 0x1b4   : > { %1394 = vst [vmem:[%s2387_s15 + $0x110] sm:$0xff] %v1330_v46  ;;  %v1331_v52 = vadd.f32 %v1267_v47, %v889_v43  ;;  %v1268_v53 = vmax.f32 %v1150_v49, 0.0  ;;  %v1152_v54 = vadd.f32 %v1151_v51, %v2375_v9  ;;  %v895_v55 = vadd.f32 %v894_v50, %v2377_v12 }
 0x1b5   : > { %v898_v56 = vpop.f32.mrf.mxu0  ;;  %v1155_v57 = vpop.f32.mrf.mxu1 }
 0x1b6   : > { %1395 = vst [vmem:[%s2387_s15 + $0x118] sm:$0xff] %v1331_v52  ;;  %v1332_v58 = vadd.f32 %v1268_v53, %v893_v48  ;;  %v1269_v59 = vmax.f32 %v1152_v54, 0.0  ;;  %v899_v60 = vadd.f32 %v898_v56, %v2370_v7  ;;  %v1156_v61 = vadd.f32 %v1155_v57, %v2372_v8 }
 0x1b7   : > { %v900_v62 = vpop.f32.mrf.mxu0  ;;  %v1157_v63 = vpop.f32.mrf.mxu1 }
 0x1b8   : > { %1396 = vst [vmem:[%s2387_s15 + $0x120] sm:$0xff] %v1332_v58  ;;  %v1333_v0 = vadd.f32 %v1269_v59, %v895_v55  ;;  %v1270_v1 = vmax.f32 %v1156_v61, 0.0  ;;  %v1158_v2 = vadd.f32 %v1157_v63, %v2375_v9  ;;  %v901_v3 = vadd.f32 %v900_v62, %v2377_v12 }
 0x1b9   : > { %v904_v4 = vpop.f32.mrf.mxu0  ;;  %v1161_v5 = vpop.f32.mrf.mxu1 }
 0x1ba   : > { %1397 = vst [vmem:[%s2387_s15 + $0x128] sm:$0xff] %v1333_v0  ;;  %v1334_v6 = vadd.f32 %v1270_v1, %v899_v60  ;;  %v1271_v10 = vmax.f32 %v1158_v2, 0.0  ;;  %v905_v11 = vadd.f32 %v904_v4, %v2370_v7  ;;  %v1162_v13 = vadd.f32 %v1161_v5, %v2372_v8 }
 0x1bb   : > { %v906_v14 = vpop.f32.mrf.mxu0  ;;  %v1163_v15 = vpop.f32.mrf.mxu1 }
 0x1bc   : > { %1398 = vst [vmem:[%s2387_s15 + $0x130] sm:$0xff] %v1334_v6  ;;  %v1335_v16 = vadd.f32 %v1271_v10, %v901_v3  ;;  %v1272_v17 = vmax.f32 %v1162_v13, 0.0  ;;  %v1164_v18 = vadd.f32 %v1163_v15, %v2375_v9  ;;  %v907_v19 = vadd.f32 %v906_v14, %v2377_v12 }
 0x1bd   : > { %v910_v20 = vpop.f32.mrf.mxu0  ;;  %v1167_v21 = vpop.f32.mrf.mxu1 }
 0x1be   : > { %1399 = vst [vmem:[%s2387_s15 + $0x138] sm:$0xff] %v1335_v16  ;;  %v1336_v22 = vadd.f32 %v1272_v17, %v905_v11  ;;  %v1273_v23 = vmax.f32 %v1164_v18, 0.0  ;;  %v911_v24 = vadd.f32 %v910_v20, %v2370_v7  ;;  %v1168_v25 = vadd.f32 %v1167_v21, %v2372_v8 }
 0x1bf   : > { %v912_v26 = vpop.f32.mrf.mxu0  ;;  %v1169_v27 = vpop.f32.mrf.mxu1 }
 0x1c0   : > { %1400 = vst [vmem:[%s2387_s15 + $0x140] sm:$0xff] %v1336_v22  ;;  %v1337_v28 = vadd.f32 %v1273_v23, %v907_v19  ;;  %v1274_v29 = vmax.f32 %v1168_v25, 0.0  ;;  %v1170_v30 = vadd.f32 %v1169_v27, %v2375_v9  ;;  %v913_v31 = vadd.f32 %v912_v26, %v2377_v12 }
 0x1c1   : > { %v916_v32 = vpop.f32.mrf.mxu0  ;;  %v1173_v33 = vpop.f32.mrf.mxu1 }
 0x1c2   : > { %1401 = vst [vmem:[%s2387_s15 + $0x148] sm:$0xff] %v1337_v28  ;;  %v1338_v34 = vadd.f32 %v1274_v29, %v911_v24  ;;  %v1275_v35 = vmax.f32 %v1170_v30, 0.0  ;;  %v917_v36 = vadd.f32 %v916_v32, %v2370_v7  ;;  %v1174_v37 = vadd.f32 %v1173_v33, %v2372_v8 }
 0x1c3   : > { %v918_v38 = vpop.f32.mrf.mxu0  ;;  %v1175_v39 = vpop.f32.mrf.mxu1 }
 0x1c4   : > { %1402 = vst [vmem:[%s2387_s15 + $0x150] sm:$0xff] %v1338_v34  ;;  %v1339_v40 = vadd.f32 %v1275_v35, %v913_v31  ;;  %v1276_v41 = vmax.f32 %v1174_v37, 0.0  ;;  %v1176_v42 = vadd.f32 %v1175_v39, %v2375_v9  ;;  %v919_v43 = vadd.f32 %v918_v38, %v2377_v12 }
 0x1c5   : > { %v922_v44 = vpop.f32.mrf.mxu0  ;;  %v1179_v45 = vpop.f32.mrf.mxu1 }
 0x1c6   : > { %1403 = vst [vmem:[%s2387_s15 + $0x158] sm:$0xff] %v1339_v40  ;;  %v1340_v46 = vadd.f32 %v1276_v41, %v917_v36  ;;  %v1277_v47 = vmax.f32 %v1176_v42, 0.0  ;;  %v923_v48 = vadd.f32 %v922_v44, %v2370_v7  ;;  %v1180_v49 = vadd.f32 %v1179_v45, %v2372_v8 }
 0x1c7   : > { %v924_v50 = vpop.f32.mrf.mxu0  ;;  %v1181_v51 = vpop.f32.mrf.mxu1 }
 0x1c8   : > { %1404 = vst [vmem:[%s2387_s15 + $0x160] sm:$0xff] %v1340_v46  ;;  %v1341_v52 = vadd.f32 %v1277_v47, %v919_v43  ;;  %v1278_v53 = vmax.f32 %v1180_v49, 0.0  ;;  %v1182_v54 = vadd.f32 %v1181_v51, %v2375_v9  ;;  %v925_v55 = vadd.f32 %v924_v50, %v2377_v12 }
 0x1c9   : > { %v928_v56 = vpop.f32.mrf.mxu0  ;;  %v1185_v57 = vpop.f32.mrf.mxu1 }
 0x1ca   : > { %1405 = vst [vmem:[%s2387_s15 + $0x168] sm:$0xff] %v1341_v52  ;;  %v1342_v58 = vadd.f32 %v1278_v53, %v923_v48  ;;  %v1279_v59 = vmax.f32 %v1182_v54, 0.0  ;;  %v929_v60 = vadd.f32 %v928_v56, %v2370_v7  ;;  %v1186_v61 = vadd.f32 %v1185_v57, %v2372_v8 }
 0x1cb   : > { %v930_v62 = vpop.f32.mrf.mxu0  ;;  %v1187_v63 = vpop.f32.mrf.mxu1 }
 0x1cc   : > { %1406 = vst [vmem:[%s2387_s15 + $0x170] sm:$0xff] %v1342_v58  ;;  %v1343_v0 = vadd.f32 %v1279_v59, %v925_v55  ;;  %v1280_v1 = vmax.f32 %v1186_v61, 0.0  ;;  %v1188_v2 = vadd.f32 %v1187_v63, %v2375_v9  ;;  %v931_v3 = vadd.f32 %v930_v62, %v2377_v12 }
 0x1cd   : > { %v934_v4 = vpop.f32.mrf.mxu0  ;;  %v1191_v5 = vpop.f32.mrf.mxu1 }
 0x1ce   : > { %1407 = vst [vmem:[%s2387_s15 + $0x178] sm:$0xff] %v1343_v0  ;;  %v1344_v6 = vadd.f32 %v1280_v1, %v929_v60  ;;  %v1281_v10 = vmax.f32 %v1188_v2, 0.0  ;;  %v935_v11 = vadd.f32 %v934_v4, %v2370_v7  ;;  %v1192_v13 = vadd.f32 %v1191_v5, %v2372_v8 }
 0x1cf   : > { %v936_v14 = vpop.f32.mrf.mxu0  ;;  %v1193_v15 = vpop.f32.mrf.mxu1 }
 0x1d0   : > { %1408 = vst [vmem:[%s2387_s15 + $0x180] sm:$0xff] %v1344_v6  ;;  %v1345_v16 = vadd.f32 %v1281_v10, %v931_v3  ;;  %v1282_v17 = vmax.f32 %v1192_v13, 0.0  ;;  %v1194_v18 = vadd.f32 %v1193_v15, %v2375_v9  ;;  %v937_v19 = vadd.f32 %v936_v14, %v2377_v12 }
 0x1d1   : > { %v940_v20 = vpop.f32.mrf.mxu0  ;;  %v1197_v21 = vpop.f32.mrf.mxu1 }
 0x1d2   : > { %1409 = vst [vmem:[%s2387_s15 + $0x188] sm:$0xff] %v1345_v16  ;;  %v1346_v22 = vadd.f32 %v1282_v17, %v935_v11  ;;  %v1283_v23 = vmax.f32 %v1194_v18, 0.0  ;;  %v941_v24 = vadd.f32 %v940_v20, %v2370_v7  ;;  %v1198_v25 = vadd.f32 %v1197_v21, %v2372_v8 }
 0x1d3   : > { %v942_v26 = vpop.f32.mrf.mxu0  ;;  %v1199_v27 = vpop.f32.mrf.mxu1 }
 0x1d4   : > { %1410 = vst [vmem:[%s2387_s15 + $0x190] sm:$0xff] %v1346_v22  ;;  %v1347_v28 = vadd.f32 %v1283_v23, %v937_v19  ;;  %v1284_v29 = vmax.f32 %v1198_v25, 0.0  ;;  %v1200_v30 = vadd.f32 %v1199_v27, %v2375_v9  ;;  %v943_v31 = vadd.f32 %v942_v26, %v2377_v12 }
 0x1d5   : > { %v946_v32 = vpop.f32.mrf.mxu0  ;;  %v1203_v33 = vpop.f32.mrf.mxu1 }
 0x1d6   : > { %1411 = vst [vmem:[%s2387_s15 + $0x198] sm:$0xff] %v1347_v28  ;;  %v1348_v34 = vadd.f32 %v1284_v29, %v941_v24  ;;  %v1285_v35 = vmax.f32 %v1200_v30, 0.0  ;;  %v947_v36 = vadd.f32 %v946_v32, %v2370_v7  ;;  %v1204_v37 = vadd.f32 %v1203_v33, %v2372_v8 }
 0x1d7   : > { %v948_v38 = vpop.f32.mrf.mxu0  ;;  %v1205_v39 = vpop.f32.mrf.mxu1 }
 0x1d8   : > { %1412 = vst [vmem:[%s2387_s15 + $0x1a0] sm:$0xff] %v1348_v34  ;;  %v1349_v40 = vadd.f32 %v1285_v35, %v943_v31  ;;  %v1286_v41 = vmax.f32 %v1204_v37, 0.0  ;;  %v1206_v42 = vadd.f32 %v1205_v39, %v2375_v9  ;;  %v949_v43 = vadd.f32 %v948_v38, %v2377_v12 }
 0x1d9   : > { %v952_v44 = vpop.f32.mrf.mxu0  ;;  %v1209_v45 = vpop.f32.mrf.mxu1 }
 0x1da   : > { %1413 = vst [vmem:[%s2387_s15 + $0x1a8] sm:$0xff] %v1349_v40  ;;  %v1350_v46 = vadd.f32 %v1286_v41, %v947_v36  ;;  %v1287_v47 = vmax.f32 %v1206_v42, 0.0  ;;  %v953_v48 = vadd.f32 %v952_v44, %v2370_v7  ;;  %v1210_v49 = vadd.f32 %v1209_v45, %v2372_v8 }
 0x1db   : > { %v954_v50 = vpop.f32.mrf.mxu0  ;;  %v1211_v51 = vpop.f32.mrf.mxu1 }
 0x1dc   : > { %1414 = vst [vmem:[%s2387_s15 + $0x1b0] sm:$0xff] %v1350_v46  ;;  %v1351_v52 = vadd.f32 %v1287_v47, %v949_v43  ;;  %v1288_v53 = vmax.f32 %v1210_v49, 0.0  ;;  %v1212_v54 = vadd.f32 %v1211_v51, %v2375_v9  ;;  %v955_v55 = vadd.f32 %v954_v50, %v2377_v12 }
 0x1dd   : > { %v958_v56 = vpop.f32.mrf.mxu0  ;;  %v1215_v57 = vpop.f32.mrf.mxu1 }
 0x1de   : > { %1415 = vst [vmem:[%s2387_s15 + $0x1b8] sm:$0xff] %v1351_v52  ;;  %v1352_v58 = vadd.f32 %v1288_v53, %v953_v48  ;;  %v1289_v59 = vmax.f32 %v1212_v54, 0.0  ;;  %v959_v60 = vadd.f32 %v958_v56, %v2370_v7  ;;  %v1216_v61 = vadd.f32 %v1215_v57, %v2372_v8 }
 0x1df   : > { %v960_v62 = vpop.f32.mrf.mxu0  ;;  %v1217_v63 = vpop.f32.mrf.mxu1 }
 0x1e0   : > { %1416 = vst [vmem:[%s2387_s15 + $0x1c0] sm:$0xff] %v1352_v58  ;;  %v1353_v0 = vadd.f32 %v1289_v59, %v955_v55  ;;  %v1290_v1 = vmax.f32 %v1216_v61, 0.0  ;;  %v1218_v2 = vadd.f32 %v1217_v63, %v2375_v9  ;;  %v961_v3 = vadd.f32 %v960_v62, %v2377_v12 }
 0x1e1   : > { %v964_v4 = vpop.f32.mrf.mxu0  ;;  %v1221_v5 = vpop.f32.mrf.mxu1 }
 0x1e2   : > { %1417 = vst [vmem:[%s2387_s15 + $0x1c8] sm:$0xff] %v1353_v0  ;;  %v1354_v6 = vadd.f32 %v1290_v1, %v959_v60  ;;  %v1291_v10 = vmax.f32 %v1218_v2, 0.0  ;;  %v965_v11 = vadd.f32 %v964_v4, %v2370_v7  ;;  %v1222_v13 = vadd.f32 %v1221_v5, %v2372_v8 }
 0x1e3   : > { %v966_v14 = vpop.f32.mrf.mxu0  ;;  %v1223_v15 = vpop.f32.mrf.mxu1 }
 0x1e4   : > { %1418 = vst [vmem:[%s2387_s15 + $0x1d0] sm:$0xff] %v1354_v6  ;;  %v1355_v16 = vadd.f32 %v1291_v10, %v961_v3  ;;  %v1292_v17 = vmax.f32 %v1222_v13, 0.0  ;;  %v1224_v18 = vadd.f32 %v1223_v15, %v2375_v9  ;;  %v967_v19 = vadd.f32 %v966_v14, %v2377_v12 }
 0x1e5   : > { %v970_v20 = vpop.f32.mrf.mxu0  ;;  %v1227_v21 = vpop.f32.mrf.mxu1 }
 0x1e6   : > { %1419 = vst [vmem:[%s2387_s15 + $0x1d8] sm:$0xff] %v1355_v16  ;;  %v1356_v22 = vadd.f32 %v1292_v17, %v965_v11  ;;  %v1293_v23 = vmax.f32 %v1224_v18, 0.0  ;;  %v971_v24 = vadd.f32 %v970_v20, %v2370_v7  ;;  %v1228_v25 = vadd.f32 %v1227_v21, %v2372_v8 }
 0x1e7   : > { %v972_v26 = vpop.f32.mrf.mxu0  ;;  %v1229_v27 = vpop.f32.mrf.mxu1 }
 0x1e8   : > { %1420 = vst [vmem:[%s2387_s15 + $0x1e0] sm:$0xff] %v1356_v22  ;;  %v1357_v28 = vadd.f32 %v1293_v23, %v967_v19  ;;  %v1294_v29 = vmax.f32 %v1228_v25, 0.0  ;;  %v1230_v30 = vadd.f32 %v1229_v27, %v2375_v9  ;;  %v973_v32 = vadd.f32 %v972_v26, %v2377_v12 }
 0x1ea   : > { %1421 = vst [vmem:[%s2387_s15 + $0x1e8] sm:$0xff] %v1357_v28  ;;  %v1358_v31 = vadd.f32 %v1294_v29, %v971_v24  ;;  %v1295_v7 = vmax.f32 %v1230_v30, 0.0 }
 0x1ec   : > { %1422 = vst [vmem:[%s2387_s15 + $0x1f0] sm:$0xff] %v1358_v31  ;;  %v1359_v8 = vadd.f32 %v1295_v7, %v973_v32 }
 0x1ee   : > { %1423 = vst [vmem:[%s2387_s15 + $0x1f8] sm:$0xff] %v1359_v8 }
 0x1ef   : > { %1671 = shalt.err (!%p1668_p13)
}
 0x1f0   : > { %s1672_s29 = scalar_lea.hbm %s2579_s23, 8192  ;;  %s1676_s10 = scalar_lea.hbm %s2647_s3, 32768 }
 0x1f1   : > { %p1673_p0 = scmp.ne.s32.totalorder %s2579_s23, %s1672_s29  ;;  %p1677_p3 = scmp.lt.s32.totalorder %s2579_s23, %s2647_s3 }
 0x1f2   : > { %p1678_p4 = scmp.lt.s32.totalorder %s1676_s10, %s1672_s29 }
 0x1f3   : > { %p1674_p1 = pnand %p1673_p0, %p1864_p7 }
 0x1f4   : > { %p1679_p5 = por %p1678_p4, %p1677_p3 }
 0x1f5   : > { %p1675_p2 = pneg %p1674_p1 }
 0x1f7   : > { %p1680_p6 = pnand %p1679_p5, %p1675_p2 }
 0x1f9   : > { %1683 = shalt.err (!%p1680_p6)
}
 0x1fa   : > { %s1769_s22 = smov 256   ;;  %s1770_s26 = smov 512  }
 0x1fb   : > { %s1771_s27 = smov 16  }
 0x1fc   : > { %1568 = dma.vmem_to_hbm [thread:$0]  (%p1864_p7), %s2581_s18, 8192, %s2579_s23, %s2587_s28, %s1769_s22, %s1770_s26, %s1771_s27  }
 0x1fd PF: > { %p1574_p8 = scmp.ge.s32.totalorder %s1766_s21, 2  ;;  %s1456_s4 = sand.u32 1, %s1730_s12  }
 0x1fe   : > { %s1457_s5 = scalar_lea.sflag [#allocation4], %s1456_s4 }
 0x1ff   : > { %p1571_p9 = pnand %p1574_p8, %p1872_p12 }
 0x201   : > { %p1572_p10 = pneg %p1571_p9 }
 0x203   : > { %1725 = dma.done.wait (%p1572_p10), %s1457_s5, 8192  }
 0x204   : > { %1727 = vsyncadd (%p1572_p10), %s1457_s5, 4294959104  ;;  %s16_s21 = sadd.s32 1, %s1766_s21   ;;  %s2652_s12 = smov %s1734_s13 }
 0x205   : > { %p13_p11 = scmp.ge.s32.totalorder %s16_s21, 6   ;;  %s2653_s13 = smov %s1738_s14 }
 0x206   : > { %s2654_s14 = smov %s1880_s8  ;;  %s2655_s15 = smov %s1746_s16 }
 0x207   : > { %s2656_s16 = smov %s1877_s7  ;;  %s2657_s17 = smov %s1758_s19 }
 0x208   : > { %s2658_s18 = smov %s1762_s20  ;;  %s2659_s19 = smov %s2662_s24 }
 0x209   : > { %s2660_s20 = smov %s2666_s25  ;;  %15 = sbr.rel (!%p13_p11) target bundleno = 6 (0x6), region = 101 }
 0x20e   :  { %1462 = vsyncpa [#allocation4], 1 }
 0x20f   :  { %1464 = vsyncpa [#allocation4 + $0x1], 1 }

</bundles_post_ra>
